<compile_context>
chip_gen: v5e
topology: v5e:2x2
jax: 0.10.0
libtpu: 0.0.40
codegen_flags: <defaults>
</compile_context>

<pallas_src>
import functools

import jax
import jax.numpy as jnp
import numpy as np
from jax.experimental import pallas as pl
from jax.experimental.pallas import tpu as pltpu


def _round_up(x, m):
    return ((x + m - 1) // m) * m


def gnn_layer_kernel(wt_ref,        # SMEM [W] int32: node-tile id per work item (scalar prefetch)
                     wb_ref,        # SMEM [W] int32: edge-block id per work item (scalar prefetch)
                     obj_ref,       # VMEM [TE, 1] int32: sorted destination ids for this edge block
                     hcat_ref,      # VMEM [TE, 4D]: [hs | hr | hqr | hs+hr] (f32 or bf16)
                     wcat_ref,      # VMEM [4D, A_pad]: [Ws; Wr; Wqr; 0] stacked, attn width padded
                     bqr_ref,       # VMEM [1, A_pad] f32  (Wqr_attn bias, zero-padded)
                     wa_ref,        # VMEM [1, A_pad] f32  (w_alpha weight row, zero-padded)
                     ba_ref,        # VMEM [1, 1] f32      (w_alpha bias)
                     out_ref):      # VMEM [TN, D] f32: resident node-tile accumulator / output
    w = pl.program_id(0)
    tile = wt_ref[w]
    prev_tile = wt_ref[jnp.maximum(w - 1, 0)]
    tn, d = out_ref.shape

    # Start of a new node tile -> (re)initialise the resident output block.
    @pl.when((w == 0) | (tile != prev_tile))
    def _init():
        out_ref[...] = jnp.full((tn, d), -jnp.inf, dtype=out_ref.dtype)

    # Fused edge-attention MLP: single K=4D MXU pass, lane-dense A_pad epilogue.
    x = jnp.dot(hcat_ref[...], wcat_ref[...], preferred_element_type=jnp.float32)
    x = jnp.maximum(x + bqr_ref[...], 0.0)                        # [TE, A_pad]
    logit = jnp.sum(x * wa_ref[...], axis=-1, keepdims=True) + ba_ref[...]
    alpha = jax.nn.sigmoid(logit)                                 # [TE, 1] f32

    # TransE message: alpha * (hs + hr); hs+hr lives in the last D lanes.
    msg = alpha * hcat_ref[:, 3 * d:].astype(jnp.float32)         # [TE, D] f32

    # Vectorized segmented max: edges are sorted by destination, so this block
    # feeds only nodes of the current tile. Per node: full-vreg compare+select
    # over [TE, D] and a sublane max reduce -> no serialized RMW chain.
    obj_v = obj_ref[...]                                          # [TE, 1] int32
    base = tile * tn
    rows = []
    for n in range(tn):                                           # static unroll (TN=8)
        sel = jnp.where(obj_v == base + n, msg, -jnp.inf)         # [TE, D]
        rows.append(jnp.max(sel, axis=0, keepdims=True))          # [1, D]
    block_max = jnp.concatenate(rows, axis=0)                     # [TN, D]
    out_ref[...] = jnp.maximum(out_ref[...], block_max)


def init_params(key, in_dim, out_dim, attn_dim, n_rel):
    ks = jax.random.split(key, 8)
    s = 0.1
    return dict(
        rel_emb=jax.random.normal(ks[0], (2 * n_rel + 1, in_dim), jnp.float32),
        Ws=jax.random.normal(ks[1], (attn_dim, in_dim), jnp.float32) * s,
        Wr=jax.random.normal(ks[2], (attn_dim, in_dim), jnp.float32) * s,
        Wqr=jax.random.normal(ks[3], (attn_dim, in_dim), jnp.float32) * s,
        bqr=jax.random.normal(ks[4], (attn_dim,), jnp.float32) * s,
        wa=jax.random.normal(ks[5], (1, attn_dim), jnp.float32) * s,
        ba=jax.random.normal(ks[6], (1,), jnp.float32) * s,
        Wh=jax.random.normal(ks[7], (out_dim, in_dim), jnp.float32) * s,
    )


@functools.partial(jax.jit,
                   static_argnames=("n_node", "edge_block", "node_tile", "use_bf16"))
def gnn_layer_forward(params, q_rel, hidden, edges, n_node,
                      edge_block=1024, node_tile=8, use_bf16=False):
    """Pallas-backed forward. Returns hidden_new: [n_node, out_dim]."""
    sub = edges[:, 4]
    rel = edges[:, 2]
    obj = edges[:, 5].astype(jnp.int32)
    r_idx = edges[:, 0]

    E = edges.shape[0]
    D = hidden.shape[1]
    A = params["Ws"].shape[0]

    TN = node_tile
    N_pad = _round_up(n_node + 1, TN)          # last row is a dump slot for padded edges
    N_tiles = N_pad // TN
    dump = N_pad - 1

    TE = min(edge_block, _round_up(E, 8))
    E_pad = _round_up(E, TE)
    NB = E_pad // TE

    # --- glue: sort edges by destination so each node tile owns a contiguous range ---
    order = jnp.argsort(obj)
    obj_s = obj[order]
    sub_s = sub[order]
    rel_s = rel[order]
    ridx_s = r_idx[order]

    hs = jnp.take(hidden, sub_s, axis=0)                      # [E, D]
    hr = jnp.take(params["rel_emb"], rel_s, axis=0)           # [E, D]
    hqr = jnp.take(jnp.take(params["rel_emb"], q_rel, axis=0), ridx_s, axis=0)

    cdt = jnp.bfloat16 if use_bf16 else jnp.float32

    # lane-dense edge-feature pack: [hs | hr | hqr | hs+hr] -> [E, 4D] (128 lanes for D=32)
    hcat = jnp.concatenate([hs, hr, hqr, hs + hr], axis=-1)
    hcat_p = jnp.pad(hcat, ((0, E_pad - E), (0, 0))).astype(cdt)        # padded rows -> 0
    obj_flat = jnp.pad(obj_s, (0, E_pad - E), constant_values=dump)     # padded edges -> dump
    obj_p = obj_flat.reshape(E_pad, 1)

    # stacked attention weights [Ws; Wr; Wqr; 0] pre-transposed, attn width padded to 128
    A_pad = max(128, _round_up(A, 128))
    Wcat = jnp.concatenate(
        [params["Ws"], params["Wr"], params["Wqr"], jnp.zeros_like(params["Ws"])],
        axis=1).T                                                       # [4D, A]
    Wcat = jnp.pad(Wcat, ((0, 0), (0, A_pad - A))).astype(cdt)          # [4D, A_pad]
    bqr = jnp.pad(params["bqr"], (0, A_pad - A))[None, :]               # [1, A_pad]
    wa = jnp.pad(params["wa"], ((0, 0), (0, A_pad - A)))                # [1, A_pad]
    ba = params["ba"][None, :]                                          # [1, 1]

    # --- glue: flattened (node_tile, edge_block) work list from per-tile segment offsets ---
    tile_lo = jnp.arange(N_tiles, dtype=jnp.int32) * TN
    estart = jnp.searchsorted(obj_flat, tile_lo, side="left")           # [N_tiles]
    eend = jnp.searchsorted(obj_flat, tile_lo + TN, side="left")        # [N_tiles]
    bstart = jnp.minimum(estart // TE, NB - 1)
    bend = jnp.maximum(bstart + 1, -(-eend // TE))                      # >= 1 block per tile
    nb = bend - bstart
    cum = jnp.cumsum(nb)
    offs = cum - nb

    W = NB + N_tiles                                                    # static upper bound
    w_ids = jnp.arange(W, dtype=jnp.int32)
    wt_raw = jnp.searchsorted(cum, w_ids, side="right")
    is_filler = wt_raw >= N_tiles
    wt = jnp.minimum(wt_raw, N_tiles - 1).astype(jnp.int32)
    wb = bstart[wt] + (w_ids - offs[wt])
    # fillers repeat (last tile, last block): idempotent under max, no re-DMA, no re-init
    wb = jnp.where(is_filler, NB - 1, wb).astype(jnp.int32)

    agg = pl.pallas_call(
        gnn_layer_kernel,
        out_shape=jax.ShapeDtypeStruct((N_pad, D), jnp.float32),
        grid_spec=pltpu.PrefetchScalarGridSpec(
            num_scalar_prefetch=2,                                      # work_tile, work_block
            grid=(W,),
            in_specs=[
                pl.BlockSpec((TE, 1), lambda w, t, b: (b[w], 0)),       # sorted obj block
                pl.BlockSpec((TE, 4 * D), lambda w, t, b: (b[w], 0)),   # pipelined edge block
                pl.BlockSpec((4 * D, A_pad), lambda w, t, b: (0, 0)),   # weights: loaded once
                pl.BlockSpec((1, A_pad), lambda w, t, b: (0, 0)),
                pl.BlockSpec((1, A_pad), lambda w, t, b: (0, 0)),
                pl.BlockSpec((1, 1), lambda w, t, b: (0, 0)),
            ],
            out_specs=pl.BlockSpec((TN, D), lambda w, t, b: (t[w], 0)), # resident node tile
        ),
        compiler_params=pltpu.CompilerParams(
            dimension_semantics=("arbitrary",),          # sequential accumulation per tile run
            vmem_limit_bytes=48 * 1024 * 1024,           # safe on v7x's 64 MiB physical VMEM
        ),
    )(wt, wb, obj_p, hcat_p, Wcat, bqr, wa, ba)

    # finalize in XLA (not as a serial tail of the last grid step):
    # torch_scatter empty-slot -> 0, then the W_h output projection.
    agg = agg[:n_node]
    agg = jnp.where(jnp.isneginf(agg), 0.0, agg)
    return agg @ params["Wh"].T


def reference_forward(params, q_rel, hidden, edges, n_node):
    """Pure-JAX reference mirroring the PyTorch forward (default flags)."""
    sub, rel, obj, r_idx = edges[:, 4], edges[:, 2], edges[:, 5], edges[:, 0]
    hs = hidden[sub]
    hr = params["rel_emb"][rel]
    hqr = params["rel_emb"][q_rel][r_idx]
    message = hs + hr
    x = jax.nn.relu(hs @ params["Ws"].T + hr @ params["Wr"].T
                    + hqr @ params["Wqr"].T + params["bqr"])
    alpha = jax.nn.sigmoid(x @ params["wa"].T + params["ba"])
    message = alpha * message
    agg = jax.ops.segment_max(message, obj, num_segments=n_node)
    agg = jnp.where(jnp.isneginf(agg), 0.0, agg)   # torch_scatter empty-slot -> 0
    return agg @ params["Wh"].T


if __name__ == "__main__":
    # small synthetic shapes consistent with the module
    in_dim, out_dim, attn_dim = 32, 32, 16
    n_rel, n_ent = 3, 20
    batchsize = 2
    n_prev_nodes = 10     # rows of `hidden` (indexed by edges[:,4])
    n_node = 12           # rows of `nodes` (indexed by edges[:,5])
    n_edges = 50

    key = jax.random.PRNGKey(0)
    kp, ke1, ke2, ke3, ke4, kq, kh = jax.random.split(key, 7)

    params = init_params(kp, in_dim, out_dim, attn_dim, n_rel)

    r_idx = jax.random.randint(ke1, (n_edges,), 0, batchsize, dtype=jnp.int32)
    rel = jax.random.randint(ke2, (n_edges,), 0, 2 * n_rel + 1, dtype=jnp.int32)
    sub = jax.random.randint(ke3, (n_edges,), 0, n_prev_nodes, dtype=jnp.int32)
    obj = jax.random.randint(ke4, (n_edges,), 0, n_node, dtype=jnp.int32)
    zeros = jnp.zeros((n_edges,), jnp.int32)
    # edges columns: [r_idx, _, rel, _, sub, obj]
    edges = jnp.stack([r_idx, zeros, rel, zeros, sub, obj], axis=1)

    q_rel = jax.random.randint(kq, (batchsize,), 0, 2 * n_rel + 1, dtype=jnp.int32)
    hidden = jax.random.normal(kh, (n_prev_nodes, in_dim), jnp.float32)

    ref = reference_forward(params, q_rel, hidden, edges, n_node)

    # f32 path: tight check against the f32 reference
    out = gnn_layer_forward(params, q_rel, hidden, edges, n_node)
    out = jax.block_until_ready(out)
    np.testing.assert_allclose(np.asarray(out), np.asarray(ref), rtol=1e-4, atol=1e-4)

    # bf16-streamed path (f32 accumulation): loose check against the f32 reference
    out_bf16 = gnn_layer_forward(params, q_rel, hidden, edges, n_node, use_bf16=True)
    out_bf16 = jax.block_until_ready(out_bf16)
    np.testing.assert_allclose(np.asarray(out_bf16), np.asarray(ref), rtol=1e-1, atol=1e-1)

    print("KERNEL_OK")
</pallas_src>

<mosaic_0001>
module attributes {stable_mosaic.version = 11 : i64} {
  func.func @gnn_layer_kernel(%arg0: i32, %arg1: memref<3xi32, #tpu.memory_space<smem>>, %arg2: memref<3xi32, #tpu.memory_space<smem>>, %arg3: memref<56x1xi32, #tpu.memory_space<vmem>>, %arg4: memref<56x128xf32, #tpu.memory_space<vmem>>, %arg5: memref<128x128xf32, #tpu.memory_space<vmem>>, %arg6: memref<1x128xf32, #tpu.memory_space<vmem>>, %arg7: memref<1x128xf32, #tpu.memory_space<vmem>>, %arg8: memref<1x1xf32, #tpu.memory_space<vmem>>, %arg9: memref<8x32xf32, #tpu.memory_space<vmem>>) attributes {dimension_semantics = [#tpu.dimension_semantics<arbitrary>], iteration_bounds = array<i64: 3>, scalar_prefetch = 2 : i64, scratch_operands = 0 : i64, tpu.core_type = #tpu.core_type<tc>, window_params = [{transform_indices = @transform_0, window_bounds = array<i64: 56, 1>}, {transform_indices = @transform_1, window_bounds = array<i64: 56, 128>}, {pipeline_mode = #tpu.pipeline_mode<synchronous>, transform_indices = @transform_2, window_bounds = array<i64: 128, 128>}, {pipeline_mode = #tpu.pipeline_mode<synchronous>, transform_indices = @transform_3, window_bounds = array<i64: 1, 128>}, {pipeline_mode = #tpu.pipeline_mode<synchronous>, transform_indices = @transform_4, window_bounds = array<i64: 1, 128>}, {pipeline_mode = #tpu.pipeline_mode<synchronous>, transform_indices = @transform_5, window_bounds = array<i64: 1, 1>}, {transform_indices = @transform_6, window_bounds = array<i64: 8, 32>}]} {
    %0 = arith.index_cast %arg0 : i32 to index
    %1 = memref.load %arg1[%0] : memref<3xi32, #tpu.memory_space<smem>>
    %c1_i32 = arith.constant 1 : i32
    %2 = arith.subi %arg0, %c1_i32 : i32
    %c0_i32 = arith.constant 0 : i32
    %3 = arith.maxsi %2, %c0_i32 : i32
    %4 = arith.index_cast %3 : i32 to index
    %5 = memref.load %arg1[%4] : memref<3xi32, #tpu.memory_space<smem>>
    %c0_i32_0 = arith.constant 0 : i32
    %6 = arith.cmpi eq, %arg0, %c0_i32_0 : i32
    %7 = arith.cmpi ne, %1, %5 : i32
    %8 = arith.ori %6, %7 : i1
    %9 = arith.extui %8 : i1 to i32
    %c0_i32_1 = arith.constant 0 : i32
    %10 = arith.cmpi ne, %9, %c0_i32_1 : i32
    scf.if %10 {
      %cst_39 = arith.constant 0xFF800000 : f32
      %113 = vector.broadcast %cst_39 : f32 to vector<8x32xf32>
      %c0_40 = arith.constant 0 : index
      %c0_41 = arith.constant 0 : index
      %114 = vector.load %arg9[%c0_40, %c0_41] : memref<8x32xf32, #tpu.memory_space<vmem>>, vector<8x32xf32>
      tpu.vector_store %arg9[%c0_40, %c0_41], %113 {strides = array<i32>} : memref<8x32xf32, #tpu.memory_space<vmem>>, vector<8x32xf32>,
    } else {
    }
    %c0 = arith.constant 0 : index
    %c0_2 = arith.constant 0 : index
    %11 = vector.load %arg4[%c0, %c0_2] : memref<56x128xf32, #tpu.memory_space<vmem>>, vector<56x128xf32>
    %c0_3 = arith.constant 0 : index
    %c0_4 = arith.constant 0 : index
    %12 = vector.load %arg5[%c0_3, %c0_4] : memref<128x128xf32, #tpu.memory_space<vmem>>, vector<128x128xf32>
    %cst = arith.constant dense<0.000000e+00> : vector<56x128xf32>
    %13 = tpu.matmul %11, %12, %cst {dimension_numbers = #tpu.dot_dimension_numbers<[1], [0], [0], [1], [0, 0, 1, 1], [], []>} : vector<56x128xf32>, vector<128x128xf32>, vector<56x128xf32> -> vector<56x128xf32>
    %c0_5 = arith.constant 0 : index
    %c0_6 = arith.constant 0 : index
    %14 = vector.load %arg6[%c0_5, %c0_6] : memref<1x128xf32, #tpu.memory_space<vmem>>, vector<1x128xf32>
    %15 = vector.broadcast %14 : vector<1x128xf32> to vector<56x128xf32>
    %16 = arith.addf %13, %15 : vector<56x128xf32>
    %cst_7 = arith.constant 0.000000e+00 : f32
    %17 = vector.broadcast %cst_7 : f32 to vector<56x128xf32>
    %18 = arith.maximumf %16, %17 : vector<56x128xf32>
    %c0_8 = arith.constant 0 : index
    %c0_9 = arith.constant 0 : index
    %19 = vector.load %arg7[%c0_8, %c0_9] : memref<1x128xf32, #tpu.memory_space<vmem>>, vector<1x128xf32>
    %20 = vector.broadcast %19 : vector<1x128xf32> to vector<56x128xf32>
    %21 = arith.mulf %18, %20 : vector<56x128xf32>
    %cst_10 = arith.constant dense<0.000000e+00> : vector<56xf32>
    %22 = vector.multi_reduction <add>, %21, %cst_10 [1] : vector<56x128xf32> to vector<56xf32>
    %23 = vector.shape_cast %22 : vector<56xf32> to vector<56x1xf32>
    %c0_11 = arith.constant 0 : index
    %c0_12 = arith.constant 0 : index
    %24 = vector.load %arg8[%c0_11, %c0_12] : memref<1x1xf32, #tpu.memory_space<vmem>>, vector<1x1xf32>
    %25 = vector.broadcast %24 : vector<1x1xf32> to vector<56x1xf32>
    %26 = arith.addf %23, %25 : vector<56x1xf32>
    %27 = arith.negf %26 : vector<56x1xf32>
    %28 = math.exp %27 : vector<56x1xf32>
    %cst_13 = arith.constant 1.000000e+00 : f32
    %29 = vector.broadcast %cst_13 : f32 to vector<56x1xf32>
    %30 = arith.addf %29, %28 : vector<56x1xf32>
    %31 = arith.divf %29, %30 : vector<56x1xf32>
    %c0_14 = arith.constant 0 : index
    %c96 = arith.constant 96 : index
    %32 = vector.load %arg4[%c0_14, %c96] : memref<56x128xf32, #tpu.memory_space<vmem>>, vector<56x32xf32>
    %33 = vector.broadcast %31 : vector<56x1xf32> to vector<56x32xf32>
    %34 = arith.mulf %33, %32 : vector<56x32xf32>
    %c0_15 = arith.constant 0 : index
    %c0_16 = arith.constant 0 : index
    %35 = vector.load %arg3[%c0_15, %c0_16] : memref<56x1xi32, #tpu.memory_space<vmem>>, vector<56x1xi32>
    %c8_i32 = arith.constant 8 : i32
    %36 = arith.muli %1, %c8_i32 : i32
    %c0_i32_17 = arith.constant 0 : i32
    %37 = arith.addi %36, %c0_i32_17 : i32
    %38 = vector.broadcast %37 : i32 to vector<56x1xi32>
    %39 = arith.cmpi eq, %35, %38 : vector<56x1xi32>
    %cst_18 = arith.constant 0xFF800000 : f32
    %40 = vector.shape_cast %39 : vector<56x1xi1> to vector<56x1xi1>
    %41 = vector.broadcast %40 : vector<56x1xi1> to vector<56x32xi1>
    %42 = vector.broadcast %cst_18 : f32 to vector<56x32xf32>
    %43 = arith.select %41, %34, %42 : vector<56x32xi1>, vector<56x32xf32>
    %cst_19 = arith.constant dense<0xFF800000> : vector<32xf32>
    %44 = vector.multi_reduction <maximumf>, %43, %cst_19 [0] : vector<56x32xf32> to vector<32xf32>
    %45 = vector.shape_cast %44 : vector<32xf32> to vector<1x32xf32>
    %c1_i32_20 = arith.constant 1 : i32
    %46 = arith.addi %36, %c1_i32_20 : i32
    %47 = vector.broadcast %46 : i32 to vector<56x1xi32>
    %48 = arith.cmpi eq, %35, %47 : vector<56x1xi32>
    %cst_21 = arith.constant 0xFF800000 : f32
    %49 = vector.shape_cast %48 : vector<56x1xi1> to vector<56x1xi1>
    %50 = vector.broadcast %49 : vector<56x1xi1> to vector<56x32xi1>
    %51 = vector.broadcast %cst_21 : f32 to vector<56x32xf32>
    %52 = arith.select %50, %34, %51 : vector<56x32xi1>, vector<56x32xf32>
    %cst_22 = arith.constant dense<0xFF800000> : vector<32xf32>
    %53 = vector.multi_reduction <maximumf>, %52, %cst_22 [0] : vector<56x32xf32> to vector<32xf32>
    %54 = vector.shape_cast %53 : vector<32xf32> to vector<1x32xf32>
    %c2_i32 = arith.constant 2 : i32
    %55 = arith.addi %36, %c2_i32 : i32
    %56 = vector.broadcast %55 : i32 to vector<56x1xi32>
    %57 = arith.cmpi eq, %35, %56 : vector<56x1xi32>
    %cst_23 = arith.constant 0xFF800000 : f32
    %58 = vector.shape_cast %57 : vector<56x1xi1> to vector<56x1xi1>
    %59 = vector.broadcast %58 : vector<56x1xi1> to vector<56x32xi1>
    %60 = vector.broadcast %cst_23 : f32 to vector<56x32xf32>
    %61 = arith.select %59, %34, %60 : vector<56x32xi1>, vector<56x32xf32>
    %cst_24 = arith.constant dense<0xFF800000> : vector<32xf32>
    %62 = vector.multi_reduction <maximumf>, %61, %cst_24 [0] : vector<56x32xf32> to vector<32xf32>
    %63 = vector.shape_cast %62 : vector<32xf32> to vector<1x32xf32>
    %c3_i32 = arith.constant 3 : i32
    %64 = arith.addi %36, %c3_i32 : i32
    %65 = vector.broadcast %64 : i32 to vector<56x1xi32>
    %66 = arith.cmpi eq, %35, %65 : vector<56x1xi32>
    %cst_25 = arith.constant 0xFF800000 : f32
    %67 = vector.shape_cast %66 : vector<56x1xi1> to vector<56x1xi1>
    %68 = vector.broadcast %67 : vector<56x1xi1> to vector<56x32xi1>
    %69 = vector.broadcast %cst_25 : f32 to vector<56x32xf32>
    %70 = arith.select %68, %34, %69 : vector<56x32xi1>, vector<56x32xf32>
    %cst_26 = arith.constant dense<0xFF800000> : vector<32xf32>
    %71 = vector.multi_reduction <maximumf>, %70, %cst_26 [0] : vector<56x32xf32> to vector<32xf32>
    %72 = vector.shape_cast %71 : vector<32xf32> to vector<1x32xf32>
    %c4_i32 = arith.constant 4 : i32
    %73 = arith.addi %36, %c4_i32 : i32
    %74 = vector.broadcast %73 : i32 to vector<56x1xi32>
    %75 = arith.cmpi eq, %35, %74 : vector<56x1xi32>
    %cst_27 = arith.constant 0xFF800000 : f32
    %76 = vector.shape_cast %75 : vector<56x1xi1> to vector<56x1xi1>
    %77 = vector.broadcast %76 : vector<56x1xi1> to vector<56x32xi1>
    %78 = vector.broadcast %cst_27 : f32 to vector<56x32xf32>
    %79 = arith.select %77, %34, %78 : vector<56x32xi1>, vector<56x32xf32>
    %cst_28 = arith.constant dense<0xFF800000> : vector<32xf32>
    %80 = vector.multi_reduction <maximumf>, %79, %cst_28 [0] : vector<56x32xf32> to vector<32xf32>
    %81 = vector.shape_cast %80 : vector<32xf32> to vector<1x32xf32>
    %c5_i32 = arith.constant 5 : i32
    %82 = arith.addi %36, %c5_i32 : i32
    %83 = vector.broadcast %82 : i32 to vector<56x1xi32>
    %84 = arith.cmpi eq, %35, %83 : vector<56x1xi32>
    %cst_29 = arith.constant 0xFF800000 : f32
    %85 = vector.shape_cast %84 : vector<56x1xi1> to vector<56x1xi1>
    %86 = vector.broadcast %85 : vector<56x1xi1> to vector<56x32xi1>
    %87 = vector.broadcast %cst_29 : f32 to vector<56x32xf32>
    %88 = arith.select %86, %34, %87 : vector<56x32xi1>, vector<56x32xf32>
    %cst_30 = arith.constant dense<0xFF800000> : vector<32xf32>
    %89 = vector.multi_reduction <maximumf>, %88, %cst_30 [0] : vector<56x32xf32> to vector<32xf32>
    %90 = vector.shape_cast %89 : vector<32xf32> to vector<1x32xf32>
    %c6_i32 = arith.constant 6 : i32
    %91 = arith.addi %36, %c6_i32 : i32
    %92 = vector.broadcast %91 : i32 to vector<56x1xi32>
    %93 = arith.cmpi eq, %35, %92 : vector<56x1xi32>
    %cst_31 = arith.constant 0xFF800000 : f32
    %94 = vector.shape_cast %93 : vector<56x1xi1> to vector<56x1xi1>
    %95 = vector.broadcast %94 : vector<56x1xi1> to vector<56x32xi1>
    %96 = vector.broadcast %cst_31 : f32 to vector<56x32xf32>
    %97 = arith.select %95, %34, %96 : vector<56x32xi1>, vector<56x32xf32>
    %cst_32 = arith.constant dense<0xFF800000> : vector<32xf32>
    %98 = vector.multi_reduction <maximumf>, %97, %cst_32 [0] : vector<56x32xf32> to vector<32xf32>
    %99 = vector.shape_cast %98 : vector<32xf32> to vector<1x32xf32>
    %c7_i32 = arith.constant 7 : i32
    %100 = arith.addi %36, %c7_i32 : i32
    %101 = vector.broadcast %100 : i32 to vector<56x1xi32>
    %102 = arith.cmpi eq, %35, %101 : vector<56x1xi32>
    %cst_33 = arith.constant 0xFF800000 : f32
    %103 = vector.shape_cast %102 : vector<56x1xi1> to vector<56x1xi1>
    %104 = vector.broadcast %103 : vector<56x1xi1> to vector<56x32xi1>
    %105 = vector.broadcast %cst_33 : f32 to vector<56x32xf32>
    %106 = arith.select %104, %34, %105 : vector<56x32xi1>, vector<56x32xf32>
    %cst_34 = arith.constant dense<0xFF800000> : vector<32xf32>
    %107 = vector.multi_reduction <maximumf>, %106, %cst_34 [0] : vector<56x32xf32> to vector<32xf32>
    %108 = vector.shape_cast %107 : vector<32xf32> to vector<1x32xf32>
    %109 = tpu.concatenate %45, %54, %63, %72, %81, %90, %99, %108 in 0 : vector<1x32xf32>, vector<1x32xf32>, vector<1x32xf32>, vector<1x32xf32>, vector<1x32xf32>, vector<1x32xf32>, vector<1x32xf32>, vector<1x32xf32> -> vector<8x32xf32>
    %c0_35 = arith.constant 0 : index
    %c0_36 = arith.constant 0 : index
    %110 = vector.load %arg9[%c0_35, %c0_36] : memref<8x32xf32, #tpu.memory_space<vmem>>, vector<8x32xf32>
    %111 = arith.maximumf %110, %109 : vector<8x32xf32>
    %c0_37 = arith.constant 0 : index
    %c0_38 = arith.constant 0 : index
    %112 = vector.load %arg9[%c0_37, %c0_38] : memref<8x32xf32, #tpu.memory_space<vmem>>, vector<8x32xf32>
    tpu.vector_store %arg9[%c0_37, %c0_38], %111 {strides = array<i32>} : memref<8x32xf32, #tpu.memory_space<vmem>>, vector<8x32xf32>,
    return
  }
  func.func @transform_0(%arg0: i32, %arg1: memref<3xi32, #tpu.memory_space<smem>>, %arg2: memref<3xi32, #tpu.memory_space<smem>>) -> (i32, i32) {
    %0 = arith.index_cast %arg0 : i32 to index
    %1 = memref.load %arg2[%0] : memref<3xi32, #tpu.memory_space<smem>>
    %c0_i32 = arith.constant 0 : i32
    %c0_i32_0 = arith.constant 0 : i32
    return %1, %c0_i32 : i32, i32
  }
  func.func @transform_1(%arg0: i32, %arg1: memref<3xi32, #tpu.memory_space<smem>>, %arg2: memref<3xi32, #tpu.memory_space<smem>>) -> (i32, i32) {
    %0 = arith.index_cast %arg0 : i32 to index
    %1 = memref.load %arg2[%0] : memref<3xi32, #tpu.memory_space<smem>>
    %c0_i32 = arith.constant 0 : i32
    %c0_i32_0 = arith.constant 0 : i32
    return %1, %c0_i32 : i32, i32
  }
  func.func @transform_2(%arg0: i32, %arg1: memref<3xi32, #tpu.memory_space<smem>>, %arg2: memref<3xi32, #tpu.memory_space<smem>>) -> (i32, i32) {
    %c0_i32 = arith.constant 0 : i32
    %c0_i32_0 = arith.constant 0 : i32
    %c0_i32_1 = arith.constant 0 : i32
    return %c0_i32, %c0_i32_0 : i32, i32
  }
  func.func @transform_3(%arg0: i32, %arg1: memref<3xi32, #tpu.memory_space<smem>>, %arg2: memref<3xi32, #tpu.memory_space<smem>>) -> (i32, i32) {
    %c0_i32 = arith.constant 0 : i32
    %c0_i32_0 = arith.constant 0 : i32
    %c0_i32_1 = arith.constant 0 : i32
    return %c0_i32, %c0_i32_0 : i32, i32
  }
  func.func @transform_4(%arg0: i32, %arg1: memref<3xi32, #tpu.memory_space<smem>>, %arg2: memref<3xi32, #tpu.memory_space<smem>>) -> (i32, i32) {
    %c0_i32 = arith.constant 0 : i32
    %c0_i32_0 = arith.constant 0 : i32
    %c0_i32_1 = arith.constant 0 : i32
    return %c0_i32, %c0_i32_0 : i32, i32
  }
  func.func @transform_5(%arg0: i32, %arg1: memref<3xi32, #tpu.memory_space<smem>>, %arg2: memref<3xi32, #tpu.memory_space<smem>>) -> (i32, i32) {
    %c0_i32 = arith.constant 0 : i32
    %c0_i32_0 = arith.constant 0 : i32
    %c0_i32_1 = arith.constant 0 : i32
    return %c0_i32, %c0_i32_0 : i32, i32
  }
  func.func @transform_6(%arg0: i32, %arg1: memref<3xi32, #tpu.memory_space<smem>>, %arg2: memref<3xi32, #tpu.memory_space<smem>>) -> (i32, i32) {
    %0 = arith.index_cast %arg0 : i32 to index
    %1 = memref.load %arg1[%0] : memref<3xi32, #tpu.memory_space<smem>>
    %c0_i32 = arith.constant 0 : i32
    %c0_i32_0 = arith.constant 0 : i32
    return %1, %c0_i32 : i32, i32
  }
}

</mosaic_0001>

<bundles_post_ra>
// kernel: custom-call
= control target key start
LH: loop header
LB: loop body
LE: loop exit
PB: predicated region body
PF: predicated region fallthrough
CT: control target
= control target key end

     0   :  { %s6_s0 = inlined_call_operand.vmem [shape: u32[2], index: 0, kind: output, shape index: {}]  }

// kernel: custom-call.4
= control target key start
LH: loop header
LB: loop body
LE: loop exit
PB: predicated region body
PF: predicated region fallthrough
CT: control target
= control target key end

     0   :  { %s6_s0 = inlined_call_operand.vmem [shape: u32[3], index: 0, kind: output, shape index: {}]  }

// kernel: gnn_layer_forward.1
= control target key start
LH: loop header
LB: loop body
LE: loop exit
PB: predicated region body
PF: predicated region fallthrough
CT: control target
= control target key end

     0   :  { %s1414_s13 = smov [#allocation3]   ;;  %s1415_s14 = smov [#allocation4]   ;;  %s2318_s0 = inlined_call_operand.vmem [shape: s32[3], index: 0, kind: input, shape index: {}]   ;;  %s2319_s2 = inlined_call_operand.vmem [shape: s32[56,1], index: 2, kind: input, shape index: {}]   ;;  %s2320_s3 = inlined_call_operand.vmem [shape: f32[56,128], index: 3, kind: input, shape index: {}]   ;;  %s2321_s4 = inlined_call_operand.vmem [shape: f32[128,128], index: 4, kind: input, shape index: {}]   ;;  %s2322_s5 = inlined_call_operand.vmem [shape: f32[1,128], index: 5, kind: input, shape index: {}]   ;;  %s2323_s6 = inlined_call_operand.vmem [shape: f32[1,128], index: 6, kind: input, shape index: {}]   ;;  %s2324_s8 = inlined_call_operand.vmem [shape: f32[16,32], index: 8, kind: output, shape index: {}]   ;;  %s2325_s1 = inlined_call_operand.vmem [shape: s32[3], index: 1, kind: input, shape index: {}]   ;;  %s2326_s7 = inlined_call_operand.<no memory space> [shape: f32[1,1], index: 7, kind: input, shape index: {}]  }
   0x1   :  { %s14_s29 = sshll.u32 %s2318_s0, 4  ;;  %s19_s10 = sshll.u32 %s2325_s1, 4  ;;  %v23_v0 = vstv %s2326_s7  ;;  %s15_s29 = int_to_ptr.vmem [resolvable:$true] %s14_s29  ;;  %s20_s10 = int_to_ptr.vmem [resolvable:$true] %s19_s10 }
   0x2   :  { %24 = vst [vmem:[#allocation5] sm:$0x1] %v23_v0  ;;  %17 = dma.vmem_to_smem %s15_s29, 16, %s1414_s13, [#allocation2] }
   0x3   :  { %22 = dma.vmem_to_smem %s20_s10, 16, %s1415_s14, [#allocation2] }
   0x4   :  { %1408 = dma.done.wait [#allocation2], 32 }
   0x5   :  { %1409 = vsyncadd [#allocation2], 4294967264 }
   0x6   :  { %27 = sfence }
   0x7   :  { %s1473_s15 = smov 0  }
   0x8 LB: > { %s1264_s0 = sadd.s32 4294967295, %s1412_s15   ;;  %p1268_p0 = scmp.ge.s32.totalorder %s1412_s15, 1  ;;  %s1412_s15 = sphi %s1473_s15, %s33_s15  }
   0x9   : > { %p251_p1 = scmp.lt.s32.totalorder %s1412_s15, 4 }
   0xb   : > { %p252_p2 = pnand %p1268_p0, %p251_p1 }
   0xd   : > { %255 = sbr.rel (%p252_p2) target bundleno = 658 (0x292), region = 44 }
  0x12   : > { %s288_s1 = sld [smem:[#allocation4 + %s1264_s0]]  ;;  %s1272_s7 = sadd.s32 4294967295, %s1264_s0 }
  0x13   : > { %s296_s16 = sld [smem:[#allocation4 + %s1264_s0]]  ;;  %p312_p3 = scmp.gt.s32.totalorder %s1272_s7, 0 }
  0x14   : > { %s304_s17 = sld [smem:[#allocation3 + %s1264_s0]]  ;;  %p315_p5 = scmp.eq.s32.totalorder %s1264_s0, 0 }
  0x15   : > { %s310_s18 = sld [smem:[#allocation3 + %s1264_s0]]  ;;  %s2393_s7 = smov (!%p312_p3, %s1272_s7), 0 }
  0x16   : > { %s314_s20 = sld [smem:[#allocation3 + %s2393_s7]] }
  0x18   : > { %s289_s19 = smul.u32 7, %s288_s1 }
  0x19   : > { %s297_s21 = smul.u32 7, %s296_s16 }
  0x1a   : > { %p290_p4 = scmp.lt.s32.totalorder %s289_s19, 6  ;;  %p305_p7 = scmp.lt.s32.totalorder %s304_s17, 1 }
  0x1b   : > { %p298_p6 = scmp.lt.s32.totalorder %s297_s21, 6 }
  0x1c   : > { %s2395_s19 = smov (!%p290_p4, %s289_s19), 6  ;;  %p316_p8 = scmp.ne.s32.totalorder %s310_s18, %s314_s20 }
  0x1d   : > { %s2397_s21 = smov (!%p298_p6, %s297_s21), 6  ;;  %s1269_s22 = sshll.u32 %s2395_s19, 3 }
  0x1e   : > { %s1484_s25 = scalar_lea.vmem %s2319_s2, %s1269_s22  ;;  %s1270_s26 = sshll.u32 %s2397_s21, 3 }
  0x1f   : > { %s1489_s29 = scalar_lea.vmem %s2320_s3, %s1270_s26  ;;  %p317_p9 = por %p316_p8, %p315_p5 }
  0x20   : > { %s2399_s17 = smov (!%p305_p7, %s304_s17), 1  ;;  %vm321_vm0 = vcmask (%p317_p9), 261120   ;;  %v1416_v1 = vmov (%p317_p9), -inf  }
  0x21   : > { %s1271_s30 = sshll.u32 %s2399_s17, 3  ;;  %320 = sbr.rel (!%p317_p9) target bundleno = 38 (0x26), region = 48 }
  0x22   : > { %s1494_s11 = scalar_lea.vmem %s2324_s8, %s1271_s30 }
  0x23   : > { %322 = vst.msk [vmem:[%s1494_s11] sm:$0xff] (%p317_p9), %vm321_vm0, %v1416_v1 }
  0x26 PF: > { %v345_v2 = vld [vmem:[%s2321_s4 + $0x78] sm:$0xff]  ;;  %v1501_v3 = vld [vmem:[%s1484_s25 + $0x10] sm:$0xff]  ;;  %s1503_s14 = sshll.u32 %s310_s18, 3  ;;  %v1512_v6 = vld [vmem:[%s1484_s25 + $0x8] sm:$0xff]  ;;  %v2327_v8 = vmov 0  }
  0x27   : > { %350 = vmatpush.msra.mxu0 %v345_v2  ;;  %1283 = vmatpush.msra.mxu1 %v345_v2  ;;  %v344_v4 = vld [vmem:[%s2321_s4 + $0x70] sm:$0xff]  ;;  %v1509_v5 = vstv %s1503_s14  ;;  %v1515_v7 = vld [vmem:[%s1484_s25] sm:$0xff]  ;;  %v343_v12 = vld [vmem:[%s2321_s4 + $0x68] sm:$0xff]  ;;  %s684_s23 = sadd.s32 1, %s1503_s14  ;;  %s754_s19 = sadd.s32 2, %s1503_s14 }
  0x28   : > { %1284 = vmatpush.msra.mxu2 %v345_v2  ;;  %1285 = vmatpush.msra.mxu3 %v345_v2  ;;  %vm617_vm1 = vcmp.eq.s32.totalorder %v1501_v3, %v1509_v5  ;;  %vm616_vm2 = vcmp.eq.s32.totalorder %v1512_v6, %v1509_v5  ;;  %vm615_vm3 = vcmp.eq.s32.totalorder %v1515_v7, %v1509_v5  ;;  %v342_v13 = vld [vmem:[%s2321_s4 + $0x60] sm:$0xff]  ;;  %v1536_v14 = vld [vmem:[%s1484_s25 + $0x28] sm:$0xff]  ;;  %v1542_v16 = vld [vmem:[%s1484_s25 + $0x18] sm:$0xff]  ;;  %v1566_v24 = vstv %s684_s23  ;;  %s824_s24 = sadd.s32 3, %s1503_s14  ;;  %s894_s26 = sadd.s32 4, %s1503_s14 }
  0x29   : > { %1346 = vset.pattern.permute.xlu0 %v2327_v8  ;;  %1345 = vset.pattern.permute.xlu1 %v2327_v8  ;;  %v624_v9 = vsel %vm617_vm1, 1, %v2327_v8  ;;  %v623_v10 = vsel %vm616_vm2, 1, %v2327_v8  ;;  %v622_v11 = vsel %vm615_vm3, 1, %v2327_v8  ;;  %v1539_v15 = vld [vmem:[%s1484_s25 + $0x20] sm:$0xff]  ;;  %v341_v17 = vld [vmem:[%s2321_s4 + $0x58] sm:$0xff]  ;;  %vm620_vm4 = vcmp.eq.s32.totalorder %v1536_v14, %v1509_v5  ;;  %v340_v18 = vld [vmem:[%s2321_s4 + $0x50] sm:$0xff] }
  0x2a   : > { %1344 = vset.pattern.permute.xlu2 %v2327_v8  ;;  %351 = vmatpush.msra.mxu0 %v344_v4  ;;  %vm619_vm5 = vcmp.eq.s32.totalorder %v1539_v15, %v1509_v5  ;;  %vm618_vm6 = vcmp.eq.s32.totalorder %v1542_v16, %v1509_v5  ;;  %v627_v19 = vsel %vm620_vm4, 1, %v2327_v8  ;;  %v339_v22 = vld [vmem:[%s2321_s4 + $0x48] sm:$0xff]  ;;  %v338_v23 = vld [vmem:[%s2321_s4 + $0x40] sm:$0xff]  ;;  %v1569_v25 = vld [vmem:[%s1484_s25 + $0x30] sm:$0xff]  ;;  %vm687_vm7 = vcmp.eq.s32.totalorder %v1512_v6, %v1566_v24  ;;  %s964_s27 = sadd.s32 5, %s1503_s14  ;;  %s1034_s12 = sadd.s32 6, %s1503_s14 }
  0x2b   : > { %1286 = vmatpush.msra.mxu1 %v344_v4  ;;  %1287 = vmatpush.msra.mxu2 %v344_v4  ;;  %v626_v20 = vsel %vm619_vm5, 1, %v2327_v8  ;;  %v625_v21 = vsel %vm618_vm6, 1, %v2327_v8  ;;  %v337_v26 = vld [vmem:[%s2321_s4 + $0x38] sm:$0xff]  ;;  %v336_v27 = vld [vmem:[%s2321_s4 + $0x30] sm:$0xff]  ;;  %vm686_vm8 = vcmp.eq.s32.totalorder %v1515_v7, %v1566_v24  ;;  %vm621_vm9 = vcmp.eq.s32.totalorder %v1569_v25, %v1509_v5  ;;  %v335_v31 = vld [vmem:[%s2321_s4 + $0x28] sm:$0xff]  ;;  %s1104_s25 = sadd.s32 7, %s1503_s14 }
  0x2c   : > { %1288 = vmatpush.msra.mxu3 %v344_v4  ;;  %636 = vperm.xlu0 %1346, %v624_v9   ;;  %v694_v28 = vsel %vm687_vm7, 1, %v2327_v8  ;;  %v693_v29 = vsel %vm686_vm8, 1, %v2327_v8  ;;  %v628_v30 = vsel %vm621_vm9, 1, %v2327_v8  ;;  %v334_v32 = vld [vmem:[%s2321_s4 + $0x20] sm:$0xff]  ;;  %v333_v33 = vld [vmem:[%s2321_s4 + $0x18] sm:$0xff]  ;;  %vm690_vm10 = vcmp.eq.s32.totalorder %v1539_v15, %v1566_v24  ;;  %v332_v34 = vld [vmem:[%s2321_s4 + $0x10] sm:$0xff] }
  0x2d   : > { %633 = vperm.xlu1 %1345, %v623_v10   ;;  %630 = vperm.xlu2 %1344, %v622_v11   ;;  %vm689_vm11 = vcmp.eq.s32.totalorder %v1542_v16, %v1566_v24  ;;  %vm688_vm12 = vcmp.eq.s32.totalorder %v1501_v3, %v1566_v24  ;;  %v697_v35 = vsel %vm690_vm10, 1, %v2327_v8  ;;  %v331_v38 = vld [vmem:[%s2321_s4 + $0x8] sm:$0xff]  ;;  %v755_v39 = vstv %s754_s19  ;;  %v330_v40 = vld [vmem:[%s2321_s4] sm:$0xff]  ;;  %v1621_v42 = vld [vmem:[%s1489_s29 + $0x10] sm:$0xff] }
  0x2e   : > { %352 = vmatpush.msra.mxu0 %v343_v12  ;;  %1289 = vmatpush.msra.mxu1 %v343_v12  ;;  %v696_v36 = vsel %vm689_vm11, 1, %v2327_v8  ;;  %v695_v37 = vsel %vm688_vm12, 1, %v2327_v8  ;;  %v1615_v41 = vld [vmem:[%s1489_s29] sm:$0xff]  ;;  %vm756_vm13 = vcmp.eq.s32.totalorder %v1515_v7, %v755_v39  ;;  %vm692_vm14 = vcmp.eq.s32.totalorder %v1569_v25, %v1566_v24  ;;  %v1624_v43 = vld [vmem:[%s1489_s29 + $0x18] sm:$0xff]  ;;  %v1629_v44 = vld [vmem:[%s1489_s29 + $0x28] sm:$0xff] }
  0x2f   : > { %1290 = vmatpush.msra.mxu2 %v343_v12  ;;  %1291 = vmatpush.msra.mxu3 %v343_v12  ;;  %vm691_vm15 = vcmp.eq.s32.totalorder %v1536_v14, %v1566_v24  ;;  %v763_v45 = vsel %vm756_vm13, 1, %v2327_v8  ;;  %v699_v46 = vsel %vm692_vm14, 1, %v2327_v8  ;;  %v1639_v48 = vld [vmem:[%s1489_s29 + $0x8] sm:$0xff]  ;;  %vm759_vm0 = vcmp.eq.s32.totalorder %v1542_v16, %v755_v39  ;;  %v327_v49 = vld [vmem:[%s1489_s29 + $0x20] sm:$0xff]  ;;  %v329_v50 = vld [vmem:[%s1489_s29 + $0x30] sm:$0xff] }
  0x30   : > { %353 = vmatpush.msra.mxu0 %v342_v13  ;;  %1292 = vmatpush.msra.mxu1 %v342_v13  ;;  %v698_v47 = vsel %vm691_vm15, 1, %v2327_v8  ;;  %vm758_vm1 = vcmp.eq.s32.totalorder %v1501_v3, %v755_v39  ;;  %vm757_vm2 = vcmp.eq.s32.totalorder %v1512_v6, %v755_v39  ;;  %v766_v51 = vsel %vm759_vm0, 1, %v2327_v8 }
  0x31   : > { %1293 = vmatpush.msra.mxu2 %v342_v13  ;;  %1294 = vmatpush.msra.mxu3 %v342_v13  ;;  %v765_v52 = vsel %vm758_vm1, 1, %v2327_v8  ;;  %v764_v53 = vsel %vm757_vm2, 1, %v2327_v8  ;;  %vm762_vm3 = vcmp.eq.s32.totalorder %v1569_v25, %v755_v39  ;;  %vm761_vm4 = vcmp.eq.s32.totalorder %v1536_v14, %v755_v39 }
  0x32   : > { %354 = vmatpush.msra.mxu0 %v341_v17  ;;  %1295 = vmatpush.msra.mxu1 %v341_v17  ;;  %vm760_vm5 = vcmp.eq.s32.totalorder %v1539_v15, %v755_v39  ;;  %v769_v54 = vsel %vm762_vm3, 1, %v2327_v8  ;;  %v768_v55 = vsel %vm761_vm4, 1, %v2327_v8  ;;  %v825_v57 = vstv %s824_s24 }
  0x33   : > { %1296 = vmatpush.msra.mxu2 %v341_v17  ;;  %1297 = vmatpush.msra.mxu3 %v341_v17  ;;  %v767_v56 = vsel %vm760_vm5, 1, %v2327_v8  ;;  %vm828_vm6 = vcmp.eq.s32.totalorder %v1501_v3, %v825_v57  ;;  %vm827_vm7 = vcmp.eq.s32.totalorder %v1512_v6, %v825_v57  ;;  %vm826_vm8 = vcmp.eq.s32.totalorder %v1515_v7, %v825_v57 }
  0x34   : > { %355 = vmatpush.msra.mxu0 %v340_v18  ;;  %1298 = vmatpush.msra.mxu1 %v340_v18  ;;  %v835_v58 = vsel %vm828_vm6, 1, %v2327_v8  ;;  %v834_v59 = vsel %vm827_vm7, 1, %v2327_v8  ;;  %v833_v60 = vsel %vm826_vm8, 1, %v2327_v8  ;;  %vm831_vm9 = vcmp.eq.s32.totalorder %v1536_v14, %v825_v57 }
  0x35   : > { %1299 = vmatpush.msra.mxu2 %v340_v18  ;;  %1300 = vmatpush.msra.mxu3 %v340_v18  ;;  %vm830_vm10 = vcmp.eq.s32.totalorder %v1539_v15, %v825_v57  ;;  %vm829_vm11 = vcmp.eq.s32.totalorder %v1542_v16, %v825_v57  ;;  %v838_v61 = vsel %vm831_vm9, 1, %v2327_v8  ;;  %v895_v0 = vstv %s894_s26 }
  0x36   : > { %645 = vperm.xlu0 %1346, %v627_v19   ;;  %642 = vperm.xlu1 %1345, %v626_v20   ;;  %v837_v62 = vsel %vm830_vm10, 1, %v2327_v8  ;;  %v836_v63 = vsel %vm829_vm11, 1, %v2327_v8  ;;  %vm897_vm12 = vcmp.eq.s32.totalorder %v1512_v6, %v895_v0  ;;  %vm896_vm13 = vcmp.eq.s32.totalorder %v1515_v7, %v895_v0 }
  0x37   : > { %639 = vperm.xlu2 %1344, %v625_v21   ;;  %356 = vmatpush.msra.mxu0 %v339_v22  ;;  %vm832_vm14 = vcmp.eq.s32.totalorder %v1569_v25, %v825_v57  ;;  %v904_v1 = vsel %vm897_vm12, 1, %v2327_v8  ;;  %v903_v2 = vsel %vm896_vm13, 1, %v2327_v8  ;;  %vm900_vm15 = vcmp.eq.s32.totalorder %v1539_v15, %v895_v0 }
  0x38   : > { %1301 = vmatpush.msra.mxu1 %v339_v22  ;;  %1302 = vmatpush.msra.mxu2 %v339_v22  ;;  %v839_v4 = vsel %vm832_vm14, 1, %v2327_v8  ;;  %vm899_vm0 = vcmp.eq.s32.totalorder %v1542_v16, %v895_v0  ;;  %vm898_vm1 = vcmp.eq.s32.totalorder %v1501_v3, %v895_v0  ;;  %v907_v5 = vsel %vm900_vm15, 1, %v2327_v8 }
  0x39   : > { %1303 = vmatpush.msra.mxu3 %v339_v22  ;;  %357 = vmatpush.msra.mxu0 %v338_v23  ;;  %v906_v9 = vsel %vm899_vm0, 1, %v2327_v8  ;;  %v905_v10 = vsel %vm898_vm1, 1, %v2327_v8  ;;  %v1683_v11 = vstv %s964_s27  ;;  %vm902_vm3 = vcmp.eq.s32.totalorder %v1569_v25, %v895_v0 }
  0x3a   : > { %1304 = vmatpush.msra.mxu1 %v338_v23  ;;  %1305 = vmatpush.msra.mxu2 %v338_v23  ;;  %vm966_vm2 = vcmp.eq.s32.totalorder %v1515_v7, %v1683_v11  ;;  %vm901_vm4 = vcmp.eq.s32.totalorder %v1536_v14, %v895_v0  ;;  %v909_v13 = vsel %vm902_vm3, 1, %v2327_v8  ;;  %vm969_vm5 = vcmp.eq.s32.totalorder %v1542_v16, %v1683_v11 }
  0x3b   : > { %1306 = vmatpush.msra.mxu3 %v338_v23  ;;  %358 = vmatpush.msra.mxu0 %v337_v26  ;;  %v973_v12 = vsel %vm966_vm2, 1, %v2327_v8  ;;  %v908_v17 = vsel %vm901_vm4, 1, %v2327_v8  ;;  %vm968_vm6 = vcmp.eq.s32.totalorder %v1501_v3, %v1683_v11  ;;  %vm967_vm7 = vcmp.eq.s32.totalorder %v1512_v6, %v1683_v11 }
  0x3c   : > { %1307 = vmatpush.msra.mxu1 %v337_v26  ;;  %1308 = vmatpush.msra.mxu2 %v337_v26  ;;  %v976_v18 = vsel %vm969_vm5, 1, %v2327_v8  ;;  %v975_v19 = vsel %vm968_vm6, 1, %v2327_v8  ;;  %v974_v20 = vsel %vm967_vm7, 1, %v2327_v8  ;;  %vm971_vm8 = vcmp.eq.s32.totalorder %v1536_v14, %v1683_v11 }
  0x3d   : > { %1309 = vmatpush.msra.mxu3 %v337_v26  ;;  %359 = vmatpush.msra.mxu0 %v336_v27  ;;  %vm970_vm9 = vcmp.eq.s32.totalorder %v1539_v15, %v1683_v11  ;;  %v978_v21 = vsel %vm971_vm8, 1, %v2327_v8  ;;  %vm972_vm11 = vcmp.eq.s32.totalorder %v1569_v25, %v1683_v11 }
  0x3e   : > { %1310 = vmatpush.msra.mxu1 %v336_v27  ;;  %1311 = vmatpush.msra.mxu2 %v336_v27  ;;  %v977_v22 = vsel %vm970_vm9, 1, %v2327_v8 }
  0x3f   : > { %1312 = vmatpush.msra.mxu3 %v336_v27  ;;  %704 = vperm.xlu0 %1346, %v694_v28   ;;  %v1347_v28 = vld [vmem:[%s2322_s5] ss:$0 sm:$0xff] }
  0x40   : > { %701 = vperm.xlu1 %1345, %v693_v29   ;;  %648 = vperm.xlu2 %1344, %v628_v30  }
  0x41   : > { %360 = vmatpush.msra.mxu0 %v335_v31  ;;  %1313 = vmatpush.msra.mxu1 %v335_v31 }
  0x42   : > { %1314 = vmatpush.msra.mxu2 %v335_v31  ;;  %1315 = vmatpush.msra.mxu3 %v335_v31 }
  0x43   : > { %361 = vmatpush.msra.mxu0 %v334_v32  ;;  %1316 = vmatpush.msra.mxu1 %v334_v32 }
  0x44   : > { %1317 = vmatpush.msra.mxu2 %v334_v32  ;;  %1318 = vmatpush.msra.mxu3 %v334_v32  ;;  %v1348_v32 = vld [vmem:[%s2323_s6] ss:$0 sm:$0xff] }
  0x45   : > { %362 = vmatpush.msra.mxu0 %v333_v33  ;;  %1319 = vmatpush.msra.mxu1 %v333_v33 }
  0x46   : > { %1320 = vmatpush.msra.mxu2 %v333_v33  ;;  %1321 = vmatpush.msra.mxu3 %v333_v33 }
  0x47   : > { %363 = vmatpush.msra.mxu0 %v332_v34  ;;  %1322 = vmatpush.msra.mxu1 %v332_v34 }
  0x48   : > { %1323 = vmatpush.msra.mxu2 %v332_v34  ;;  %1324 = vmatpush.msra.mxu3 %v332_v34 }
  0x49   : > { %713 = vperm.xlu0 %1346, %v697_v35   ;;  %710 = vperm.xlu1 %1345, %v696_v36  }
  0x4a   : > { %707 = vperm.xlu2 %1344, %v695_v37   ;;  %364 = vmatpush.msra.mxu0 %v331_v38 }
  0x4b   : > { %1325 = vmatpush.msra.mxu1 %v331_v38  ;;  %1326 = vmatpush.msra.mxu2 %v331_v38 }
  0x4c   : > { %1327 = vmatpush.msra.mxu3 %v331_v38  ;;  %365 = vmatpush.msra.mxu0 %v330_v40 }
  0x4d   : > { %1328 = vmatpush.msra.mxu1 %v330_v40  ;;  %1329 = vmatpush.msra.mxu2 %v330_v40 }
  0x4e   : > { %1330 = vmatpush.msra.mxu3 %v330_v40  ;;  %366 = vmatmul.f32.vlgmr.msra.gmra.mxu0 %v1615_v41 }
  0x4f   : > { %372 = vmatmul.f32.vlgmr.msra.gmra.mxu1 %v1621_v42  ;;  %375 = vmatmul.f32.vlgmr.msra.gmra.mxu2 %v1624_v43 }
  0x50   : > { %381 = vmatmul.f32.vlgmr.msra.gmra.mxu3 %v1629_v44 }
  0x51   : > { %771 = vperm.xlu0 %1346, %v763_v45   ;;  %719 = vperm.xlu1 %1345, %v699_v46  }
  0x52   : > { %716 = vperm.xlu2 %1344, %v698_v47  }
  0x56   : > { %369 = vmatmul.f32.gmra.mxu0 %v1639_v48 }
  0x57   : > { %378 = vmatmul.f32.gmra.mxu2 %v327_v49 }
  0x58   : > { %384 = vmatmul.f32.gmra.mxu3 %v329_v50 }
  0x59   : > { %780 = vperm.xlu0 %1346, %v766_v51   ;;  %777 = vperm.xlu1 %1345, %v765_v52  }
  0x5a   : > { %774 = vperm.xlu2 %1344, %v764_v53  }
  0x61   : > { %789 = vperm.xlu0 %1346, %v769_v54   ;;  %786 = vperm.xlu1 %1345, %v768_v55  }
  0x62   : > { %783 = vperm.xlu2 %1344, %v767_v56  }
  0x69   : > { %847 = vperm.xlu0 %1346, %v835_v58   ;;  %844 = vperm.xlu1 %1345, %v834_v59  }
  0x6a   : > { %841 = vperm.xlu2 %1344, %v833_v60  }
  0x71   : > { %856 = vperm.xlu0 %1346, %v838_v61   ;;  %853 = vperm.xlu1 %1345, %v837_v62  }
  0x72   : > { %850 = vperm.xlu2 %1344, %v836_v63  }
  0x79   : > { %914 = vperm.xlu0 %1346, %v904_v1   ;;  %911 = vperm.xlu1 %1345, %v903_v2  }
  0x7a   : > { %859 = vperm.xlu2 %1344, %v839_v4  }
  0x81   : > { %923 = vperm.xlu0 %1346, %v907_v5   ;;  %920 = vperm.xlu1 %1345, %v906_v9  }
  0x82   : > { %917 = vperm.xlu2 %1344, %v905_v10  }
  0x87   : > { %v1709_v24 = vpop.permute.xlu2 %630 }
  0x89   : > { %981 = vperm.xlu0 %1346, %v973_v12   ;;  %929 = vperm.xlu1 %1345, %v909_v13  }
  0x8a   : > { %926 = vperm.xlu2 %1344, %v908_v17   ;;  %v1742_v17 = vstv %s1034_s12 }
  0x8b   : > { %vm1037_vm10 = vcmp.eq.s32.totalorder %v1512_v6, %v1742_v17  ;;  %vm1036_vm12 = vcmp.eq.s32.totalorder %v1515_v7, %v1742_v17  ;;  %vm1041_vm13 = vcmp.eq.s32.totalorder %v1536_v14, %v1742_v17  ;;  %vm1038_vm14 = vcmp.eq.s32.totalorder %v1501_v3, %v1742_v17 }
  0x8c   : > { %v1048_v11 = vsel %vm1041_vm13, 1, %v2327_v8  ;;  %vm1040_vm15 = vcmp.eq.s32.totalorder %v1539_v15, %v1742_v17  ;;  %vm1042_vm1 = vcmp.eq.s32.totalorder %v1569_v25, %v1742_v17 }
  0x91   : > { %990 = vperm.xlu0 %1346, %v976_v18   ;;  %987 = vperm.xlu1 %1345, %v975_v19   ;;  %v1721_v33 = vpop.permute.xlu2 %639 }
  0x92   : > { %984 = vperm.xlu2 %1344, %v974_v20   ;;  %v1044_v20 = vsel %vm1037_vm10, 1, %v2327_v8 }
  0x99   : > { %996 = vperm.xlu1 %1345, %v978_v21   ;;  %v979_v21 = vsel %vm972_vm11, 1, %v2327_v8 }
  0x9a   : > { %993 = vperm.xlu2 %1344, %v977_v22   ;;  %v1727_v55 = vpop.permute.xlu2 %648 }
  0x9b   : > { %2343 = vst [vmem:[#allocation8_spill] sm:$0xff] %v1727_v55 }
  0x9e   : > { %v1711_v26 = vpop.permute.xlu0 %636 }
  0x9f   : > { %v1707_v23 = vpop.permute.xlu1 %633 }
  0xa4   : > { %v1733_v9 = vpop.permute.xlu2 %707 }
  0xa8   : > { %v1713_v27 = vpop.permute.xlu1 %642  ;;  %v1723_v36 = vpop.permute.xlu0 %645 }
  0xa9   : > { %2342 = vst [vmem:[#allocation7_spill] sm:$0xff] %v1713_v27 }
  0xac   : > { %v1740_v13 = vpop.permute.xlu2 %716 }
  0xb1   : > { %v1729_v58 = vpop.permute.xlu0 %704 }
  0xb2   : > { %v1725_v38 = vpop.permute.xlu1 %701 }
  0xb4   : > { %v1756_v22 = vpop.permute.xlu2 %774 }
  0xbb   : > { %v1731_v60 = vpop.permute.xlu1 %710  ;;  %v1735_v10 = vpop.permute.xlu0 %713 }
  0xbc   : > { %2344 = vst [vmem:[#allocation9_spill] sm:$0xff] %v1735_v10 }
  0xc3   : > { %v1737_v12 = vpop.permute.xlu1 %719  ;;  %v1744_v18 = vpop.permute.xlu0 %771 }
  0xc4   : > { %2345 = vst [vmem:[#allocation10_spill] sm:$0xff] %v1737_v12 }
  0xcb   : > { %v367_v29 = vpop.f32.mrf.mxu0  ;;  %v1746_v19 = vpop.permute.xlu1 %777 }
  0xcc   : > { %v368_v30 = vadd.f32 %v1347_v28, %v367_v29  ;;  %v373_v31 = vpop.f32.mrf.mxu1  ;;  %v1043_v29 = vsel %vm1036_vm12, 1, %v2327_v8 }
  0xcd   : > { %v374_v34 = vadd.f32 %v1347_v28, %v373_v31  ;;  %v1045_v31 = vsel %vm1038_vm14, 1, %v2327_v8 }
  0xce   : > { %v388_v35 = vmax.f32 %v368_v30, 0.0 }
  0xcf   : > { %v390_v37 = vmax.f32 %v374_v34, 0.0  ;;  %v1776_v34 = vpop.permute.xlu2 %783 }
  0xd0   : > { %v399_v39 = vmul.f32 %v1348_v32, %v388_v35  ;;  %2346 = vst [vmem:[#allocation11_spill] sm:$0xff] %v1776_v34  ;;  %v1047_v35 = vsel %vm1040_vm15, 1, %v2327_v8 }
  0xd1   : > { %v401_v40 = vmul.f32 %v1348_v32, %v390_v37 }
  0xd2   : > { %v376_v45 = vpop.f32.mrf.mxu2  ;;  %406 = vadd.xlane.f32.xlu0 %v399_v39 }
  0xd3   : > { %v377_v46 = vadd.f32 %v1347_v28, %v376_v45  ;;  %v382_v47 = vpop.f32.mrf.mxu3  ;;  %410 = vadd.xlane.f32.xlu1 %v401_v40  ;;  %v370_v49 = vpop.f32.mrf.mxu0  ;;  %v1049_v45 = vsel %vm1042_vm1, 1, %v2327_v8 }
  0xd4   : > { %v383_v50 = vadd.f32 %v1347_v28, %v382_v47  ;;  %v371_v51 = vadd.f32 %v1347_v28, %v370_v49  ;;  %v1763_v30 = vpop.permute.xlu1 %786 }
  0xd5   : > { %v391_v52 = vmax.f32 %v377_v46, 0.0 }
  0xd6   : > { %v393_v53 = vmax.f32 %v383_v50, 0.0  ;;  %v389_v54 = vmax.f32 %v371_v51, 0.0 }
  0xd7   : > { %v402_v59 = vmul.f32 %v1348_v32, %v391_v52  ;;  %v1792_v46 = vpop.permute.xlu2 %841 }
  0xd8   : > { %v404_v56 = vmul.f32 %v1348_v32, %v393_v53  ;;  %v400_v57 = vmul.f32 %v1348_v32, %v389_v54 }
  0xda   : > { %416 = vadd.xlane.f32.xlu2 %v404_v56  ;;  %v379_v61 = vpop.f32.mrf.mxu2  ;;  %408 = vadd.xlane.f32.xlu0 %v400_v57 }
  0xdb   : > { %v380_v62 = vadd.f32 %v1347_v28, %v379_v61  ;;  %412 = vadd.xlane.f32.xlu1 %v402_v59  ;;  %v385_v63 = vpop.f32.mrf.mxu3 }
  0xdc   : > { %v386_v0 = vadd.f32 %v1347_v28, %v385_v63  ;;  %v1760_v28 = vpop.permute.xlu0 %780  ;;  %v1784_v40 = vpop.permute.xlu1 %844 }
  0xdd   : > { %v392_v1 = vmax.f32 %v380_v62, 0.0 }
  0xde   : > { %v394_v2 = vmax.f32 %v386_v0, 0.0 }
  0xdf   : > { %v403_v4 = vmul.f32 %v1348_v32, %v392_v1  ;;  %v1802_v51 = vpop.permute.xlu2 %850 }
  0xe0   : > { %v405_v5 = vmul.f32 %v1348_v32, %v394_v2  ;;  %v1770_v32 = vstv %s1104_s25 }
  0xe1   : > { %vm1107_vm0 = vcmp.eq.s32.totalorder %v1512_v6, %v1770_v32  ;;  %vm1106_vm2 = vcmp.eq.s32.totalorder %v1515_v7, %v1770_v32  ;;  %vm1108_vm3 = vcmp.eq.s32.totalorder %v1501_v3, %v1770_v32  ;;  %vm1110_vm4 = vcmp.eq.s32.totalorder %v1539_v15, %v1770_v32 }
  0xe2   : > { %414 = vadd.xlane.f32.xlu2 %v403_v4  ;;  %418 = vadd.xlane.f32.xlu0 %v405_v5  ;;  %v1114_v39 = vsel %vm1107_vm0, 1, %v2327_v8  ;;  %v1113_v6 = vsel %vm1106_vm2, 1, %v2327_v8  ;;  %v1115_v49 = vsel %vm1108_vm3, 1, %v2327_v8  ;;  %v1117_v7 = vsel %vm1110_vm4, 1, %v2327_v8  ;;  %v1349_v4 = vld [vmem:[#allocation5] ss:$0 sm:$0xff] }
  0xe3   : > { %vm1112_vm13 = vcmp.eq.s32.totalorder %v1569_v25, %v1770_v32 }
  0xe4   : > { %v1781_v37 = vpop.permute.xlu0 %789  ;;  %v1797_v50 = vpop.permute.xlu1 %853 }
  0xe5   : > { %2347 = vst [vmem:[#allocation12_spill] sm:$0xff] %v1781_v37 }
  0xe6   : > { %2348 = vst [vmem:[#allocation13_spill] sm:$0xff] %v1797_v50 }
  0xe7   : > { %v1808_v53 = vpop.permute.xlu2 %859 }
  0xe8   : > { %2349 = vst [vmem:[#allocation14_spill] sm:$0xff] %v1808_v53 }
  0xec   : > { %v1794_v47 = vpop.permute.xlu0 %847  ;;  %v1806_v3 = vpop.permute.xlu1 %911 }
  0xef   : > { %v1814_v57 = vpop.permute.xlu2 %917 }
  0xf4   : > { %1054 = vperm.xlu1 %1345, %v1044_v20   ;;  %v1804_v52 = vpop.permute.xlu0 %856  ;;  %v1812_v56 = vpop.permute.xlu1 %920 }
  0xf6   : > { %999 = vperm.xlu0 %1346, %v979_v21  }
  0xf7   : > { %v1820_v61 = vpop.permute.xlu2 %926 }
  0xfa   : > { %1051 = vperm.xlu2 %1344, %v1043_v29  }
  0xfc   : > { %1066 = vperm.xlu1 %1345, %v1048_v11   ;;  %v1810_v54 = vpop.permute.xlu0 %914  ;;  %v1818_v15 = vpop.permute.xlu1 %929 }
  0xfd   : > { %2351 = vst [vmem:[#allocation16_spill] sm:$0xff] %v1818_v15 }
  0xfe   : > { %1057 = vperm.xlu0 %1346, %v1045_v31  }
  0xff   : > { %v1826_v0 = vpop.permute.xlu2 %984 }
 0x102   : > { %1063 = vperm.xlu2 %1344, %v1047_v35  }
 0x104   : > { %1124 = vperm.xlu1 %1345, %v1114_v39   ;;  %v1816_v59 = vpop.permute.xlu0 %923  ;;  %v1824_v63 = vpop.permute.xlu1 %987 }
 0x105   : > { %2350 = vst [vmem:[#allocation15_spill] sm:$0xff] %v1816_v59 }
 0x106   : > { %1069 = vperm.xlu0 %1346, %v1049_v45   ;;  %2353 = vst [vmem:[#allocation18_spill] sm:$0xff] %v1824_v63 }
 0x107   : > { %v1832_v5 = vpop.permute.xlu2 %993 }
 0x108   : > { %2354 = vst [vmem:[#allocation19_spill] sm:$0xff] %v1832_v5 }
 0x10a   : > { %1121 = vperm.xlu2 %1344, %v1113_v6  }
 0x10c   : > { %v1822_v62 = vpop.permute.xlu0 %981  ;;  %v1830_v2 = vpop.permute.xlu1 %996 }
 0x10d   : > { %2352 = vst [vmem:[#allocation17_spill] sm:$0xff] %v1822_v62 }
 0x10e   : > { %1127 = vperm.xlu0 %1346, %v1115_v49  }
 0x112   : > { %1133 = vperm.xlu2 %1344, %v1117_v7  }
 0x114   : > { %v1828_v1 = vpop.permute.xlu0 %990 }
 0x145   : > { %v407_v20 = vpop.xlane.xlu0 %406 }
 0x146   : > { %v411_v21 = vpop.xlane.xlu1 %410  ;;  %v424_v29 = vadd.f32 %v1349_v4, %v407_v20 }
 0x147   : > { %v426_v11 = vadd.f32 %v1349_v4, %v411_v21 }
 0x148   : > { %v1273_v31 = vmul.f32 -1.442695, %v424_v29 }
 0x149   : > { %v1275_v35 = vmul.f32 -1.442695, %v426_v11 }
 0x14a   : > { %1350 = vpow2.f32 %v1273_v31 }
 0x14b   : > { %1352 = vpow2.f32 %v1275_v35 }
 0x14d   : > { %v417_v39 = vpop.xlane.xlu2 %416  ;;  %v409_v45 = vpop.xlane.xlu0 %408 }
 0x14e   : > { %v429_v6 = vadd.f32 %v1349_v4, %v417_v39  ;;  %v413_v49 = vpop.xlane.xlu1 %412  ;;  %v425_v7 = vadd.f32 %v1349_v4, %v409_v45 }
 0x14f   : > { %v427_v8 = vadd.f32 %v1349_v4, %v413_v49 }
 0x150   : > { %v1351_v15 = vpop.eup %1350  ;;  %v1278_v53 = vmul.f32 -1.442695, %v429_v6  ;;  %v1274_v59 = vmul.f32 -1.442695, %v425_v7 }
 0x151   : > { %v1353_v37 = vpop.eup %1352  ;;  %v452_v12 = vadd.f32 1.0, %v1351_v15  ;;  %v1276_v55 = vmul.f32 -1.442695, %v427_v8 }
 0x152   : > { %v454_v5 = vadd.f32 1.0, %v1353_v37  ;;  %1354 = vpow2.f32 %v1278_v53 }
 0x153   : > { %1356 = vrcp.f32 %v452_v12  ;;  %vm464_vm5 = vweird.f32 %v452_v12  ;;  %v470_v15 = vand.u32 2147483648, %v452_v12 }
 0x154   : > { %1358 = vrcp.f32 %v454_v5  ;;  %vm494_vm6 = vweird.f32 %v454_v5 }
 0x155   : > { %1360 = vpow2.f32 %v1276_v55  ;;  %v415_v20 = vpop.xlane.xlu2 %414  ;;  %v419_v21 = vpop.xlane.xlu0 %418  ;;  %v468_v55 = vand.u32 2147483647, %v452_v12 }
 0x156   : > { %1362 = vpow2.f32 %v1274_v59  ;;  %v428_v29 = vadd.f32 %v1349_v4, %v415_v20  ;;  %v430_v11 = vadd.f32 %v1349_v4, %v419_v21  ;;  %v500_v4 = vand.u32 2147483648, %v454_v5 }
 0x157   : > { %vm469_vm12 = vcmp.eq.f32.partialorder %v468_v55, 8.507059e+37 }
 0x158   : > { %v1355_v31 = vpop.eup %1354  ;;  %v1277_v35 = vmul.f32 -1.442695, %v428_v29  ;;  %v1279_v39 = vmul.f32 -1.442695, %v430_v11  ;;  %v498_v29 = vand.u32 2147483647, %v454_v5 }
 0x159   : > { %v1357_v45 = vpop.eup %1356  ;;  %v1834_v49 = vadd.f32 1.0, %v1355_v31  ;;  %v501_v10 = vor.u32 1.1754944e-38, %v500_v4 }
 0x15a   : > { %v1359_v6 = vpop.eup %1358  ;;  %1364 = vpow2.f32 %v1277_v35  ;;  %v460_v8 = vmul.f32 %v1357_v45, %v452_v12  ;;  %vm465_vm8 = vweird.f32 %v1357_v45  ;;  %vm499_vm10 = vcmp.eq.f32.partialorder %v498_v29, 8.507059e+37 }
 0x15b   : > { %v1361_v37 = vpop.eup %1360  ;;  %1366 = vrcp.f32 %v1834_v49  ;;  %v490_v53 = vmul.f32 %v1359_v6, %v454_v5  ;;  %vm495_vm7 = vweird.f32 %v1359_v6  ;;  %vm466_vm11 = vmor %vm464_vm5, %vm465_vm8  ;;  %v471_v5 = vor.u32 1.1754944e-38, %v470_v15 }
 0x15c   : > { %v1363_v7 = vpop.eup %1362  ;;  %v455_v59 = vadd.f32 1.0, %v1361_v37  ;;  %1368 = vpow2.f32 %v1279_v39  ;;  %v461_v20 = vsub.f32 1.0, %v460_v8  ;;  %vm1839_vm9 = vmor %vm494_vm6, %vm495_vm7  ;;  %vm539_vm6 = vweird.f32 %v1834_v49 }
 0x15d   : > { %v491_v21 = vsub.f32 1.0, %v490_v53  ;;  %v1837_v11 = vadd.f32 1.0, %v1363_v7 }
 0x15e   : > { %1370 = vrcp.f32 %v455_v59  ;;  %v462_v31 = vmul.f32 %v1357_v45, %v461_v20  ;;  %v513_v34 = vand.u32 2147483647, %v455_v59  ;;  %vm509_vm15 = vweird.f32 %v455_v59 }
 0x15f   : > { %v492_v35 = vmul.f32 %v1359_v6, %v491_v21  ;;  %1372 = vrcp.f32 %v1837_v11 }
 0x160   : > { %v1365_v50 = vpop.eup %1364  ;;  %v463_v37 = vadd.f32 %v1357_v45, %v462_v31  ;;  %vm514_vm1 = vcmp.eq.f32.partialorder %v513_v34, 8.507059e+37 }
 0x161   : > { %v1843_v39 = vpop.eup %1366  ;;  %v1845_v8 = vadd.f32 1.0, %v1365_v50  ;;  %v493_v53 = vadd.f32 %v1359_v6, %v492_v35 }
 0x162   : > { %v1369_v7 = vpop.eup %1368  ;;  %v467_v20 = vsel %vm466_vm11, %v1357_v45, %v463_v37  ;;  %v535_v21 = vmul.f32 %v1843_v39, %v1834_v49  ;;  %v515_v37 = vand.u32 2147483648, %v455_v59  ;;  %vm540_vm3 = vweird.f32 %v1843_v39 }
 0x163   : > { %1374 = vrcp.f32 %v1845_v8  ;;  %v1852_v4 = vadd.f32 1.0, %v1369_v7  ;;  %v497_v50 = vsel %vm1839_vm9, %v1359_v6, %v493_v53  ;;  %v472_v31 = vsel %vm469_vm12, %v471_v5, %v467_v20  ;;  %vm541_vm8 = vmor %vm539_vm6, %vm540_vm3 }
 0x164   : > { %v1371_v29 = vpop.eup %1370  ;;  %v502_v12 = vsel %vm499_vm10, %v501_v10, %v497_v50  ;;  %566 = vperm.xlu1 %1345, %v472_v31   ;;  %v536_v55 = vsub.f32 1.0, %v535_v21  ;;  %v2357_v6 = vmov 0   ;;  %v516_v21 = vor.u32 1.1754944e-38, %v515_v37 }
 0x165   : > { %1376 = vrcp.f32 %v1852_v4  ;;  %576 = vperm.xlu0 %1346, %v502_v12   ;;  %v505_v15 = vmul.f32 %v1371_v29, %v455_v59  ;;  %v1859_v35 = vpop.eup %1372  ;;  %vm510_vm14 = vweird.f32 %v1371_v29  ;;  %v1119_v53 = vsel %vm1112_vm13, 1, %v2357_v6 }
 0x166   : > { %v537_v50 = vmul.f32 %v1843_v39, %v536_v55  ;;  %v475_v25 = vmul.f32 %v1859_v35, %v1837_v11  ;;  %vm511_vm0 = vmor %vm509_vm15, %vm510_vm14  ;;  %v530_v63 = vand.u32 2147483648, %v1845_v8  ;;  %vm524_vm4 = vweird.f32 %v1845_v8 }
 0x167   : > { %v506_v45 = vsub.f32 1.0, %v505_v15  ;;  %vm554_vm9 = vweird.f32 %v1852_v4  ;;  %vm479_vm13 = vweird.f32 %v1837_v11  ;;  %vm480_vm14 = vweird.f32 %v1859_v35 }
 0x168   : > { %v538_v55 = vadd.f32 %v1843_v39, %v537_v50  ;;  %v476_v37 = vsub.f32 1.0, %v475_v25  ;;  %vm1039_vm3 = vcmp.eq.s32.totalorder %v1542_v16, %v1742_v17  ;;  %vm655_vm6 = vcmp.eq.s32.totalorder %v1723_v36, 1 }
 0x169   : > { %v1375_v7 = vpop.eup %1374  ;;  %v507_v27 = vmul.f32 %v1371_v29, %v506_v45  ;;  %v528_v45 = vand.u32 2147483647, %v1845_v8 }
 0x16a   : > { %v520_v10 = vmul.f32 %v1375_v7, %v1845_v8  ;;  %vm525_vm2 = vweird.f32 %v1375_v7  ;;  %v542_v50 = vsel %vm541_vm8, %v1843_v39, %v538_v55  ;;  %v477_v25 = vmul.f32 %v1859_v35, %v476_v37 }
 0x16b   : > { %v1377_v5 = vpop.eup %1376  ;;  %v508_v20 = vadd.f32 %v1371_v29, %v507_v27  ;;  %vm526_vm5 = vmor %vm524_vm4, %vm525_vm2  ;;  %vm529_vm7 = vcmp.eq.f32.partialorder %v528_v45, 8.507059e+37  ;;  %vm1111_vm2 = vcmp.eq.s32.totalorder %v1536_v14, %v1770_v32  ;;  %vm1109_vm4 = vcmp.eq.s32.totalorder %v1542_v16, %v1770_v32  ;;  %v1899_v14 = vpop.permute.xlu0 %999 }
 0x16c   : > { %v521_v31 = vsub.f32 1.0, %v520_v10  ;;  %v550_v12 = vmul.f32 %v1377_v5, %v1852_v4  ;;  %vm555_vm10 = vweird.f32 %v1377_v5  ;;  %vm724_vm8 = vcmp.eq.s32.totalorder %v1731_v60, 1 }
 0x16d   : > { %v512_v15 = vsel %vm511_vm0, %v1371_v29, %v508_v20  ;;  %1139 = vperm.xlu0 %1346, %v1119_v53   ;;  %v545_v29 = vand.u32 2147483648, %v1834_v49  ;;  %v531_v53 = vor.u32 1.1754944e-38, %v530_v63  ;;  %v543_v20 = vand.u32 2147483647, %v1834_v49  ;;  %vm556_vm12 = vmor %vm554_vm9, %vm555_vm10 }
 0x16e   : > { %v517_v62 = vsel %vm514_vm1, %v516_v21, %v512_v15  ;;  %v522_v27 = vmul.f32 %v1375_v7, %v521_v31  ;;  %v551_v59 = vsub.f32 1.0, %v550_v12  ;;  %v560_v63 = vand.u32 2147483648, %v1852_v4  ;;  %vm481_vm0 = vmor %vm479_vm13, %vm480_vm14 }
 0x16f   : > { %581 = vperm.xlu2 %1344, %v517_v62   ;;  %v546_v31 = vor.u32 1.1754944e-38, %v545_v29  ;;  %vm544_vm11 = vcmp.eq.f32.partialorder %v543_v20, 8.507059e+37  ;;  %v558_v49 = vand.u32 2147483647, %v1852_v4  ;;  %v485_v15 = vand.u32 2147483648, %v1837_v11 }
 0x170   : > { %v523_v10 = vadd.f32 %v1375_v7, %v522_v27  ;;  %v552_v34 = vmul.f32 %v1377_v5, %v551_v59  ;;  %v561_v45 = vor.u32 1.1754944e-38, %v560_v63  ;;  %v483_v27 = vand.u32 2147483647, %v1837_v11 }
 0x171   : > { %v547_v12 = vsel %vm544_vm11, %v546_v31, %v542_v50  ;;  %vm559_vm15 = vcmp.eq.f32.partialorder %v558_v49, 8.507059e+37  ;;  %v486_v4 = vor.u32 1.1754944e-38, %v485_v15  ;;  %v1046_v11 = vsel %vm1039_vm3, 1, %v2357_v6 }
 0x172   : > { %v527_v21 = vsel %vm526_vm5, %v1375_v7, %v523_v10  ;;  %v553_v8 = vadd.f32 %v1377_v5, %v552_v34  ;;  %v478_v7 = vadd.f32 %v1859_v35, %v477_v25  ;;  %vm484_vm1 = vcmp.eq.f32.partialorder %v483_v27, 8.507059e+37  ;;  %v1895_v10 = vpop.permute.xlu2 %1051 }
 0x173   : > { %v532_v62 = vsel %vm529_vm7, %v531_v53, %v527_v21  ;;  %v1903_v53 = vpop.permute.xlu1 %1054  ;;  %v1905_v17 = vpop.permute.xlu0 %1057  ;;  %vm653_vm5 = vcmp.eq.s32.totalorder %v1721_v33, 1  ;;  %vm726_vm7 = vcmp.eq.s32.totalorder %v1740_v13, 1  ;;  %vm794_vm9 = vcmp.eq.s32.totalorder %v1760_v28, 1 }
 0x174   : > { %586 = vperm.xlu1 %1345, %v532_v62   ;;  %v557_v39 = vsel %vm556_vm12, %v1377_v5, %v553_v8  ;;  %v482_v55 = vsel %vm481_vm0, %v1859_v35, %v478_v7  ;;  %v1118_v5 = vsel %vm1111_vm2, 1, %v2357_v6  ;;  %v1116_v35 = vsel %vm1109_vm4, 1, %v2357_v6 }
 0x175   : > { %v562_v59 = vsel %vm559_vm15, %v561_v45, %v557_v39  ;;  %v487_v37 = vsel %vm484_vm1, %v486_v4, %v482_v55  ;;  %vm864_vm10 = vcmp.eq.s32.totalorder %v1802_v51, 1  ;;  %vm796_vm11 = vcmp.eq.s32.totalorder %v1763_v30, 1 }
 0x176   : > { %vm664_vm13 = vcmask 1048320   ;;  %vm936_vm3 = vcmp.eq.s32.totalorder %v1820_v61, 1  ;;  %vm934_vm4 = vcmp.eq.s32.totalorder %v1812_v56, 1  ;;  %vm1004_vm15 = vcmp.eq.s32.totalorder %v1828_v1, 1 }
 0x177   : > { %591 = vperm.xlu2 %1344, %v547_v12   ;;  %vm1006_vm14 = vcmp.eq.s32.totalorder %v1830_v2, 1  ;;  %vm792_vm2 = vcmp.eq.s32.totalorder %v1756_v22, 1  ;;  %v2367_v22 = vld [vmem:[#allocation9_spill] sm:$0xff] }
 0x17a   : > { %v1897_v29 = vpop.permute.xlu2 %1063 }
 0x17b   : > { %v1067_v21 = vpop.permute.xlu1 %1066  ;;  %v1909_v16 = vpop.permute.xlu0 %1069 }
 0x17c   : > { %596 = vperm.xlu1 %1345, %v562_v59   ;;  %vm1076_vm12 = vcmp.eq.s32.totalorder %v1067_v21, 1 }
 0x17f   : > { %571 = vperm.xlu2 %1344, %v487_v37  }
 0x182   : > { %v1901_v34 = vpop.permute.xlu2 %1121 }
 0x183   : > { %v1911_v6 = vpop.permute.xlu1 %1124  ;;  %v1917_v50 = vpop.permute.xlu0 %1127 }
 0x184   : > { %1136 = vperm.xlu1 %1345, %v1118_v5   ;;  %vm1143_vm0 = vcmp.eq.s32.totalorder %v1917_v50, 1  ;;  %vm1142_vm1 = vcmp.eq.s32.totalorder %v1911_v6, 1 }
 0x187   : > { %1060 = vperm.xlu2 %1344, %v1046_v11  }
 0x18a   : > { %v1907_v20 = vpop.permute.xlu2 %1133 }
 0x18c   : > { %1130 = vperm.xlu1 %1345, %v1116_v35  }
 0x1c9   : > { %v582_v32 = vpop.permute.xlu2 %581 }
 0x1ca   : > { %v1914_v62 = vmul.f32 %v582_v32, %v1624_v43 }
 0x1cc   : > { %v660_v25 = vsel %vm653_vm5, %v1914_v62, -inf  ;;  %v731_v60 = vsel %vm724_vm8, %v1914_v62, -inf  ;;  %v801_v28 = vsel %vm794_vm9, %v1914_v62, -inf  ;;  %vm652_vm5 = vcmp.eq.s32.totalorder %v1711_v26, 1  ;;  %v2377_v26 = vld [vmem:[#allocation10_spill] sm:$0xff] }
 0x1cd   : > { %vm723_vm8 = vcmp.eq.s32.totalorder %v1733_v9, 1  ;;  %vm1141_vm9 = vcmp.eq.s32.totalorder %v1901_v34, 1  ;;  %v1951_v56 = vsel %vm664_vm13, %v660_v25, -inf  ;;  %v1954_v31 = vsel %vm664_vm13, %v731_v60, -inf  ;;  %v2362_v25 = vld [vmem:[#allocation18_spill] sm:$0xff] }
 0x1ce   : > { %v1957_v8 = vsel %vm664_vm13, %v801_v28, -inf  ;;  %v941_v63 = vsel %vm934_vm4, %v1914_v62, -inf  ;;  %v1011_v39 = vsel %vm1004_vm15, %v1914_v62, -inf  ;;  %vm1002_vm4 = vcmp.eq.s32.totalorder %v1826_v0, 1 }
 0x1cf   : > { %v1993_v27 = vsel %vm664_vm13, %v941_v63, -inf  ;;  %v2008_v55 = vsel %vm664_vm13, %v1011_v39, -inf }
 0x1d1   : > { %v592_v43 = vpop.permute.xlu2 %591 }
 0x1d2   : > { %v1929_v33 = vmul.f32 %v592_v43, %v1629_v44  ;;  %v871_v44 = vsel %vm864_vm10, %v1914_v62, -inf  ;;  %vm862_vm10 = vcmp.eq.s32.totalorder %v1784_v40, 1  ;;  %v2361_v43 = vld [vmem:[#allocation17_spill] sm:$0xff] }
 0x1d3   : > { %vm1001_vm15 = vcmp.eq.s32.totalorder %v2361_v43, 1 }
 0x1d4   : > { %v662_v51 = vsel %vm655_vm6, %v1929_v33, -inf  ;;  %v733_v49 = vsel %vm726_vm7, %v1929_v33, -inf  ;;  %v803_v7 = vsel %vm796_vm11, %v1929_v33, -inf  ;;  %vm2358_vm6 = vcmp.eq.s32.totalorder %v1804_v52, 1 }
 0x1d5   : > { %v873_v36 = vsel %vm2358_vm6, %v1929_v33, -inf  ;;  %v943_v13 = vsel %vm936_vm3, %v1929_v33, -inf  ;;  %v1013_v30 = vsel %vm1006_vm14, %v1929_v33, -inf  ;;  %vm793_vm7 = vcmp.eq.s32.totalorder %v1746_v19, 1 }
 0x1d6   : > { %v567_v12 = vpop.permute.xlu1 %566  ;;  %v1083_v52 = vsel %vm1076_vm12, %v1929_v33, -inf  ;;  %vm932_vm11 = vcmp.eq.s32.totalorder %v1810_v54, 1  ;;  %v1999_v2 = vsel %vm664_vm13, %v662_v51, -inf  ;;  %v2002_v59 = vsel %vm664_vm13, %v733_v49, -inf  ;;  %v2366_v49 = vld [vmem:[#allocation7_spill] sm:$0xff] }
 0x1d7   : > { %v1974_v15 = vmul.f32 %v567_v12, %v1615_v41  ;;  %v577_v45 = vpop.permute.xlu0 %576  ;;  %v1990_v41 = vsel %vm664_vm13, %v871_v44, -inf  ;;  %vm861_vm14 = vcmp.eq.s32.totalorder %v1792_v46, 1  ;;  %v2017_v37 = vsel %vm664_vm13, %v873_v36, -inf }
 0x1d8   : > { %v1987_v1 = vmul.f32 %v577_v45, %v1621_v42  ;;  %v2005_v42 = vsel %vm664_vm13, %v803_v7, -inf  ;;  %v2020_v5 = vsel %vm664_vm13, %v943_v13, -inf  ;;  %v2023_v11 = vsel %vm664_vm13, %v1013_v30, -inf  ;;  %v2368_v7 = vld [vmem:[#allocation11_spill] sm:$0xff] }
 0x1d9   : > { %v572_v61 = vpop.permute.xlu2 %571  ;;  %v1148_v35 = vsel %vm1141_vm9, %v1974_v15, -inf  ;;  %vm2359_vm6 = vcmp.eq.s32.totalorder %v1709_v24, 1  ;;  %vm2360_vm12 = vcmp.eq.s32.totalorder %v1725_v38, 1  ;;  %v2037_v32 = vsel %vm664_vm13, %v1083_v52, -inf }
 0x1da   : > { %v2014_v4 = vmul.f32 %v572_v61, %v1639_v48  ;;  %v657_v48 = vsel %vm2359_vm6, %v1974_v15, -inf  ;;  %v728_v21 = vsel %vm2360_vm12, %v1974_v15, -inf  ;;  %vm1003_vm3 = vcmp.eq.s32.totalorder %v2362_v25, 1  ;;  %v1378_v25 = vld [vmem:[%s1489_s29 + $0x20] sm:$0xff] }
 0x1db   : > { %v1150_v34 = vsel %vm1143_vm0, %v1987_v1, -inf  ;;  %vm2363_vm9 = vcmp.eq.s32.totalorder %v1707_v23, 1  ;;  %vm2364_vm6 = vcmp.eq.s32.totalorder %v1729_v58, 1  ;;  %vm2365_vm12 = vcmp.eq.s32.totalorder %v1744_v18, 1 }
 0x1dc   : > { %v658_v24 = vsel %vm2363_vm9, %v2014_v4, -inf  ;;  %v729_v38 = vsel %vm2364_vm6, %v2014_v4, -inf  ;;  %v798_v60 = vsel %vm2365_vm12, %v1974_v15, -inf  ;;  %v659_v28 = vsel %vm652_vm5, %v1987_v1, -inf }
 0x1dd   : > { %v2057_v44 = vsel %vm664_vm13, %v658_v24, -inf  ;;  %v730_v23 = vsel %vm723_vm8, %v1987_v1, -inf  ;;  %v2063_v50 = vsel %vm664_vm13, %v729_v38, -inf  ;;  %vm1071_vm0 = vcmp.eq.s32.totalorder %v1895_v10, 1  ;;  %v2369_v24 = vld [vmem:[#allocation13_spill] sm:$0xff]  ;;  %v2370_v38 = vld [vmem:[#allocation15_spill] sm:$0xff] }
 0x1de   : > { %v1149_v58 = vsel %vm1142_vm1, %v2014_v4, -inf  ;;  %v799_v9 = vsel %vm792_vm2, %v2014_v4, -inf  ;;  %vm1072_vm5 = vcmp.eq.s32.totalorder %v1903_v53, 1  ;;  %vm1073_vm8 = vcmp.eq.s32.totalorder %v1905_v17, 1 }
 0x1df   : > { %v2079_v63 = vsel %vm664_vm13, %v1148_v35, -inf  ;;  %v2082_v6 = vsel %vm664_vm13, %v1150_v34, -inf  ;;  %v2085_v12 = vsel %vm664_vm13, %v657_v48, -inf  ;;  %v2088_v51 = vsel %vm664_vm13, %v799_v9, -inf }
 0x1e0   : > { %v2095_v39 = vsel %vm664_vm13, %v659_v28, -inf  ;;  %v2098_v45 = vsel %vm664_vm13, %v728_v21, -inf  ;;  %v869_v13 = vsel %vm862_vm10, %v2014_v4, -inf  ;;  %v2106_v52 = vsel %vm664_vm13, %v1149_v58, -inf  ;;  %v2371_v28 = vld [vmem:[#allocation19_spill] sm:$0xff] }
 0x1e1   : > { %v1061_v30 = vpop.permute.xlu2 %1060  ;;  %v2109_v61 = vsel %vm664_vm13, %v730_v23, -inf  ;;  %v800_v35 = vsel %vm793_vm7, %v1987_v1, -inf  ;;  %v2115_v48 = vsel %vm664_vm13, %v869_v13, -inf  ;;  %v805_v21 = vsel %vm664_vm13, %v798_v60, -inf  ;;  %v1140_v13 = vpop.permute.xlu0 %1139 }
 0x1e2   : > { %vm1074_vm12 = vcmp.eq.s32.totalorder %v1061_v30, 1  ;;  %v939_v34 = vsel %vm932_vm11, %v2014_v4, -inf  ;;  %vm865_vm10 = vcmp.eq.s32.totalorder %v2369_v24, 1  ;;  %vm935_vm9 = vcmp.eq.s32.totalorder %v2370_v38, 1 }
 0x1e3   : > { %vm1005_vm2 = vcmp.eq.s32.totalorder %v2371_v28, 1  ;;  %vm1075_vm7 = vcmp.eq.s32.totalorder %v1897_v29, 1  ;;  %v868_v19 = vsel %vm861_vm14, %v1974_v15, -inf  ;;  %vm2372_vm1 = vcmp.eq.s32.totalorder %v1794_v47, 1 }
 0x1e4   : > { %v870_v60 = vsel %vm2372_vm1, %v1987_v1, -inf  ;;  %vm2373_vm6 = vcmp.eq.s32.totalorder %v1806_v3, 1  ;;  %v2137_v23 = vsel %vm664_vm13, %v939_v34, -inf  ;;  %v1081_v58 = vsel %vm1074_vm12, %v1914_v62, -inf }
 0x1e5   : > { %v938_v54 = vsel %vm2373_vm6, %v1974_v15, -inf  ;;  %vm2374_vm11 = vcmp.eq.s32.totalorder %v1814_v57, 1  ;;  %v1009_v47 = vsel %vm1002_vm4, %v2014_v4, -inf  ;;  %v2149_v3 = vsel %vm664_vm13, %v800_v35, -inf }
 0x1e6   : > { %v940_v9 = vsel %vm2374_vm11, %v1987_v1, -inf  ;;  %v1008_v30 = vsel %vm1001_vm15, %v1974_v15, -inf  ;;  %v1010_v57 = vsel %vm1003_vm3, %v1987_v1, -inf  ;;  %v2158_v34 = vsel %vm664_vm13, %v1009_v47, -inf  ;;  %v587_v46 = vpop.permute.xlu1 %586 }
 0x1e7   : > { %v875_v40 = vsel %vm664_vm13, %v868_v19, -inf  ;;  %v2162_v0 = vsel %vm664_vm13, %v870_v60, -inf  ;;  %v2165_v35 = vsel %vm664_vm13, %v938_v54, -inf  ;;  %v2170_v36 = vsel %vm664_vm13, %v1081_v58, -inf  ;;  %v2376_v60 = vld [vmem:[#allocation8_spill] sm:$0xff] }
 0x1e8   : > { %2375 = vst [vmem:[#allocation17_spill] sm:$0xff] %v2170_v36  ;;  %v603_v18 = vmul.f32 %v1378_v25, %v587_v46  ;;  %v2174_v47 = vsel %vm664_vm13, %v940_v9, -inf  ;;  %v1078_v19 = vsel %vm1071_vm0, %v1974_v15, -inf  ;;  %vm656_vm14 = vcmp.eq.s32.totalorder %v2376_v60, 1  ;;  %v2378_v54 = vld [vmem:[#allocation12_spill] sm:$0xff] }
 0x1e9   : > { %vm727_vm15 = vcmp.eq.s32.totalorder %v2377_v26, 1  ;;  %vm797_vm3 = vcmp.eq.s32.totalorder %v2378_v54, 1  ;;  %vm1147_vm4 = vcmp.eq.s32.totalorder %v1140_v13, 1  ;;  %v2183_v43 = vsel %vm664_vm13, %v1008_v30, -inf }
 0x1ea   : > { %v2186_v58 = vsel %vm664_vm13, %v1010_v57, -inf  ;;  %v1079_v9 = vsel %vm1072_vm5, %v2014_v4, -inf  ;;  %v1080_v10 = vsel %vm1073_vm8, %v1987_v1, -inf  ;;  %vm2379_vm0 = vcmp.eq.s32.totalorder %v1907_v20, 1  ;;  %v2383_v20 = vld [vmem:[#allocation14_spill] sm:$0xff]  ;;  %v2384_v1 = vld [vmem:[#allocation16_spill] sm:$0xff] }
 0x1eb   : > { %v1152_v15 = vsel %vm2379_vm0, %v603_v18, -inf  ;;  %vm2380_vm1 = vcmp.eq.s32.totalorder %v2366_v49, 1  ;;  %vm2381_vm6 = vcmp.eq.s32.totalorder %v2367_v22, 1  ;;  %vm2382_vm12 = vcmp.eq.s32.totalorder %v2368_v7, 1 }
 0x1ec   : > { %v661_v46 = vsel %vm2380_vm1, %v603_v18, -inf  ;;  %v732_v30 = vsel %vm2381_vm6, %v603_v18, -inf  ;;  %v802_v57 = vsel %vm2382_vm12, %v603_v18, -inf  ;;  %v2206_v17 = vsel %vm664_vm13, %v1078_v19, -inf }
 0x1ed   : > { %v669_v25 = vsel %vm664_vm13, %v661_v46, -inf  ;;  %v739_v53 = vsel %vm664_vm13, %v732_v30, -inf  ;;  %v809_v4 = vsel %vm664_vm13, %v802_v57, -inf  ;;  %vm867_vm5 = vcmp.eq.s32.totalorder %v2383_v20, 1 }
 0x1ee   : > { %vm937_vm8 = vcmp.eq.s32.totalorder %v2384_v1, 1  ;;  %vm1007_vm11 = vcmp.eq.s32.totalorder %v1899_v14, 1  ;;  %v2212_v49 = vsel %vm664_vm13, %v1152_v15, -inf  ;;  %v670_v22 = vmax.f32 %v2085_v12, %v669_v25 }
 0x1ef   : > { %v740_v7 = vmax.f32 %v2098_v45, %v739_v53  ;;  %v810_v46 = vmax.f32 %v805_v21, %v809_v4  ;;  %v872_v30 = vsel %vm865_vm10, %v603_v18, -inf  ;;  %v942_v19 = vsel %vm935_vm9, %v603_v18, -inf  ;;  %v597_v53 = vpop.permute.xlu1 %596 }
 0x1f0   : > { %v1012_v57 = vsel %vm1005_vm2, %v603_v18, -inf  ;;  %v1082_v36 = vsel %vm1075_vm7, %v603_v18, -inf  ;;  %v2385_v15 = vmax.f32 %v2057_v44, %v1999_v2  ;;  %v2386_v45 = vmax.f32 %v2063_v50, %v2002_v59  ;;  %v1379_v2 = vld [vmem:[%s1489_s29 + $0x30] sm:$0xff]  ;;  %s1418_s29 = smov 32  }
 0x1f1   : > { %v2387_v24 = vmax.f32 %v2088_v51, %v2005_v42  ;;  %v879_v38 = vsel %vm664_vm13, %v872_v30, -inf  ;;  %v949_v4 = vsel %vm664_vm13, %v942_v19, -inf  ;;  %v1019_v29 = vsel %vm664_vm13, %v1012_v57, -inf }
 0x1f2   : > { %v675_v12 = vmax.f32 %v670_v22, %v2385_v15  ;;  %v745_v21 = vmax.f32 %v740_v7, %v2386_v45  ;;  %v880_v28 = vmax.f32 %v875_v40, %v879_v38  ;;  %v2237_v18 = vsel %vm664_vm13, %v1082_v36, -inf }
 0x1f3   : > { %v815_v25 = vmax.f32 %v810_v46, %v2387_v24  ;;  %v605_v44 = vmul.f32 %v1379_v2, %v597_v53  ;;  %v950_v59 = vmax.f32 %v2165_v35, %v949_v4  ;;  %v2242_v50 = vsel %vm664_vm13, %v1079_v9, -inf }
 0x1f4   : > { %v2245_v42 = vsel %vm664_vm13, %v1080_v10, -inf  ;;  %v1160_v51 = vmax.f32 %v2079_v63, %v2212_v49  ;;  %v2388_v40 = vmax.f32 %v2115_v48, %v2017_v37  ;;  %v1020_v36 = vmax.f32 %v2183_v43, %v1019_v29 }
 0x1f5   : > { %v1090_v7 = vmax.f32 %v2206_v17, %v2237_v18  ;;  %v1154_v35 = vsel %vm1147_vm4, %v605_v44, -inf  ;;  %v663_v9 = vsel %vm656_vm14, %v605_v44, -inf  ;;  %v734_v10 = vsel %vm727_vm15, %v605_v44, -inf }
 0x1f6   : > { %v885_v22 = vmax.f32 %v880_v28, %v2388_v40  ;;  %v804_v63 = vsel %vm797_vm3, %v605_v44, -inf  ;;  %vm1077_vm2 = vcmp.eq.s32.totalorder %v1909_v16, 1  ;;  %v2264_v37 = vsel %vm664_vm13, %v1154_v35, -inf }
 0x1f7   : > { %v673_v48 = vsel %vm664_vm13, %v663_v9, -inf  ;;  %v743_v43 = vsel %vm664_vm13, %v734_v10, -inf  ;;  %v813_v13 = vsel %vm664_vm13, %v804_v63, -inf  ;;  %v1164_v60 = vmax.f32 %v2082_v6, %v2264_v37  ;;  %v1137_v20 = vpop.permute.xlu1 %1136 }
 0x1f8   : > { %v674_v26 = vmax.f32 %v2095_v39, %v673_v48  ;;  %v744_v49 = vmax.f32 %v2109_v61, %v743_v43  ;;  %v814_v54 = vmax.f32 %v2149_v3, %v813_v13  ;;  %v874_v46 = vsel %vm867_vm5, %v605_v44, -inf }
 0x1f9   : > { %v944_v30 = vsel %vm937_vm8, %v605_v44, -inf  ;;  %v2389_v19 = vmax.f32 %v2137_v23, %v2020_v5  ;;  %v1014_v15 = vsel %vm1007_vm11, %v605_v44, -inf  ;;  %v883_v3 = vsel %vm664_vm13, %v874_v46, -inf }
 0x1fa   : > { %v676_v6 = vmax.f32 %v674_v26, %v1951_v56  ;;  %v746_v39 = vmax.f32 %v744_v49, %v1954_v31  ;;  %v816_v61 = vmax.f32 %v814_v54, %v1957_v8  ;;  %v884_v45 = vmax.f32 %v2162_v0, %v883_v3 }
 0x1fb   : > { %v955_v57 = vmax.f32 %v950_v59, %v2389_v19  ;;  %v953_v1 = vsel %vm664_vm13, %v944_v30, -inf  ;;  %v1023_v24 = vsel %vm664_vm13, %v1014_v15, -inf  ;;  %v2390_v5 = vmax.f32 %v2158_v34, %v2023_v11 }
 0x1fc   : > { %vm1146_vm9 = vcmp.eq.s32.totalorder %v1137_v20, 1  ;;  %v677_v23 = vmax.f32 %v675_v12, %v676_v6  ;;  %v747_v56 = vmax.f32 %v745_v21, %v746_v39  ;;  %v817_v38 = vmax.f32 %v815_v25, %v816_v61 }
 0x1fd   : > { %v1025_v14 = vmax.f32 %v1020_v36, %v2390_v5  ;;  %v1153_v31 = vsel %vm1146_vm9, %v1929_v33, -inf  ;;  %v886_v8 = vmax.f32 %v884_v45, %v1990_v41  ;;  %v954_v53 = vmax.f32 %v2174_v47, %v953_v1  ;;  %v2391_v5 = vld [vmem:[#allocation17_spill] sm:$0xff] }
 0x1fe   : > { %v1024_v0 = vmax.f32 %v2186_v58, %v1023_v24  ;;  %v1161_v28 = vsel %vm664_vm13, %v1153_v31, -inf  ;;  %v678_v4 = vrot.slane %v677_v23, 4  ;;  %v748_v29 = vrot.slane %v747_v56, 4 }
 0x1ff   : > { %v818_v2 = vrot.slane %v817_v38, 4  ;;  %v1162_v11 = vmax.f32 %v2106_v52, %v1161_v28  ;;  %v887_v34 = vmax.f32 %v885_v22, %v886_v8  ;;  %v956_v12 = vmax.f32 %v954_v53, %v1993_v27  ;;  %v1131_v22 = vpop.permute.xlu1 %1130 }
 0x200   : > { %v1026_v21 = vmax.f32 %v1024_v0, %v2008_v55  ;;  %v679_v25 = vmax.f32 %v677_v23, %v678_v4  ;;  %v749_v33 = vmax.f32 %v747_v56, %v748_v29  ;;  %v1084_v41 = vsel %vm1077_vm2, %v605_v44, -inf }
 0x201   : > { %v819_v59 = vmax.f32 %v817_v38, %v818_v2  ;;  %v1165_v47 = vmax.f32 %v1160_v51, %v1162_v11  ;;  %v888_v58 = vrot.slane %v887_v34, 4  ;;  %v957_v40 = vmax.f32 %v955_v57, %v956_v12 }
 0x202   : > { %v1027_v36 = vmax.f32 %v1025_v14, %v1026_v21  ;;  %v680_v35 = vrot.slane %v679_v25, 2  ;;  %v750_v9 = vrot.slane %v749_v33, 2  ;;  %v1093_v52 = vsel %vm664_vm13, %v1084_v41, -inf }
 0x203   : > { %v820_v10 = vrot.slane %v819_v59, 2  ;;  %v889_v63 = vmax.f32 %v887_v34, %v888_v58  ;;  %v958_v27 = vrot.slane %v957_v40, 4  ;;  %v1094_v55 = vmax.f32 %v2245_v42, %v1093_v52 }
 0x204   : > { %v1028_v37 = vrot.slane %v1027_v36, 4  ;;  %vm1144_vm10 = vcmp.eq.s32.totalorder %v1131_v22, 1  ;;  %v681_v48 = vmax.f32 %v679_v25, %v680_v35  ;;  %v751_v43 = vmax.f32 %v749_v33, %v750_v9 }
 0x205   : > { %v821_v16 = vmax.f32 %v819_v59, %v820_v10  ;;  %v1151_v44 = vsel %vm1144_vm10, %v1914_v62, -inf  ;;  %v890_v51 = vrot.slane %v889_v63, 2  ;;  %v959_v13 = vmax.f32 %v957_v40, %v958_v27 }
 0x206   : > { %v1029_v26 = vmax.f32 %v1027_v36, %v1028_v37  ;;  %v1158_v49 = vsel %vm664_vm13, %v1151_v44, -inf  ;;  %v682_v54 = vrot.slane %v681_v48, 1  ;;  %v752_v46 = vrot.slane %v751_v43, 1 }
 0x207   : > { %v822_v30 = vrot.slane %v821_v16, 1  ;;  %v1166_v19 = vmax.f32 %v1164_v60, %v1158_v49  ;;  %v891_v57 = vmax.f32 %v889_v63, %v890_v51  ;;  %v960_v15 = vrot.slane %v959_v13, 2 }
 0x208   : > { %v1030_v6 = vrot.slane %v1029_v26, 2  ;;  %v683_v39 = vmax.f32 %v681_v48, %v682_v54  ;;  %v753_v42 = vmax.f32 %v751_v43, %v752_v46  ;;  %v1092_v3 = vmax.f32 %v2242_v50, %v2037_v32 }
 0x209   : > { %v823_v61 = vmax.f32 %v821_v16, %v822_v30  ;;  %v1167_v20 = vmax.f32 %v1165_v47, %v1166_v19  ;;  %v892_v62 = vrot.slane %v891_v57, 1  ;;  %v961_v45 = vmax.f32 %v959_v13, %v960_v15  ;;  %v1188_v47 = vld [vmem:[%s1494_s11] sm:$0xff] }
 0x20a   : > { %v1031_v1 = vmax.f32 %v1029_v26, %v1030_v6  ;;  %v1095_v24 = vmax.f32 %v1090_v7, %v1092_v3  ;;  %v1096_v14 = vmax.f32 %v1094_v55, %v2391_v5  ;;  %vm1174_vm13 = vcmask 1040384  }
 0x20b   : > { %vm1176_vm7 = vcmask 1041408   ;;  %v1168_v60 = vrot.slane %v1167_v20, 4  ;;  %v962_v23 = vrot.slane %v961_v45, 1  ;;  %vm1178_vm14 = vcmask 1042432  }
 0x20c   : > { %v1032_v56 = vrot.slane %v1031_v1, 1  ;;  %v893_v38 = vmax.f32 %v891_v57, %v892_v62  ;;  %v1097_v31 = vmax.f32 %v1095_v24, %v1096_v14  ;;  %v1175_v8 = vsel %vm1174_vm13, %v683_v39, %v753_v42 }
 0x20d   : > { %vm1180_vm15 = vcmask 1043456   ;;  %v1169_v32 = vmax.f32 %v1167_v20, %v1168_v60  ;;  %v963_v50 = vmax.f32 %v961_v45, %v962_v23  ;;  %v1177_v53 = vsel %vm1176_vm7, %v1175_v8, %v823_v61 }
 0x20e   : > { %vm1182_vm3 = vcmask 1044480   ;;  %v1033_v0 = vmax.f32 %v1031_v1, %v1032_v56  ;;  %v1098_v28 = vrot.slane %v1097_v31, 4  ;;  %v1179_v17 = vsel %vm1178_vm14, %v1177_v53, %v893_v38 }
 0x20f   : > { %v1170_v18 = vrot.slane %v1169_v32, 2  ;;  %v1181_v7 = vsel %vm1180_vm15, %v1179_v17, %v963_v50  ;;  %vm1184_vm4 = vcmask 1045504   ;;  %vm1186_vm0 = vcmask 1046528  }
 0x210   : > { %v1099_v4 = vmax.f32 %v1097_v31, %v1098_v28  ;;  %v1183_v29 = vsel %vm1182_vm3, %v1181_v7, %v1033_v0  ;;  %vm1194_vm1 = vcmask 261120  }
 0x211   : > { %v1171_v2 = vmax.f32 %v1169_v32, %v1170_v18 }
 0x212   : > { %v1100_v11 = vrot.slane %v1099_v4, 2 }
 0x213   : > { %v1172_v34 = vrot.slane %v1171_v2, 1 }
 0x214   : > { %v1101_v12 = vmax.f32 %v1099_v4, %v1100_v11 }
 0x215   : > { %v1173_v25 = vmax.f32 %v1171_v2, %v1172_v34 }
 0x216   : > { %v1102_v21 = vrot.slane %v1101_v12, 1 }
 0x218   : > { %v1103_v33 = vmax.f32 %v1101_v12, %v1102_v21 }
 0x21a   : > { %v1185_v59 = vsel %vm1184_vm4, %v1183_v29, %v1103_v33 }
 0x21b   : > { %v1187_v41 = vsel %vm1186_vm0, %v1185_v59, %v1173_v25 }
 0x21c   : > { %1190 = vrot.lane.b32.xlu0 %v1187_v41, %s1418_s29 }
 0x28e   : > { %v1191_v58 = vpop.permute.xlu0 %1190 }
 0x28f   : > { %v1193_v40 = vmax.f32 %v1188_v47, %v1191_v58 }
 0x291   : > { %1195 = vst.msk [vmem:[%s1494_s11] sm:$0xff] %vm1194_vm1, %v1193_v40 }
 0x292 PF: > { %s33_s15 = sadd.s32 1, %s1412_s15  }
 0x293   : > { %p30_p10 = scmp.ge.s32.totalorder %s33_s15, 5  }
 0x295   :  { %32 = sbr.rel (!%p30_p10) target bundleno = 8 (0x8), region = 81 }

</bundles_post_ra>
